<compile_context>
chip_gen: v5e
topology: v5e:2x2
jax: 0.10.0
libtpu: 0.0.40
codegen_flags: <defaults>
</compile_context>

<pallas_src>
import jax
import jax.numpy as jnp
from jax.experimental import pallas as pl
from jax.experimental.pallas import tpu as pltpu

DATA_DIMENSION = 8
NUM_LAYERS = 6
HIDDEN = 1          # nn.GRU(hidden_size=1)
LANE_PAD = 128      # layers live on lanes 0..5; padded to the native lane width
SUBLANE = 8         # batch padded to full sublanes
N_ROWS = 16         # packed-parameter rows (10 per-layer rows + 3 W_ih_l0 rows + pad)


def gru_wavefront_kernel(x_ref, pp_ref, out_ref):
    """Whole 6-layer GRU stack as a layer-time wavefront.

    x_ref  : (Bp, T, D)        batch-first input, batch padded to 8 sublanes (VMEM)
    pp_ref : (16, LANE_PAD)    packed params, layers on lanes:
                               row 0..2 : wih_r, wih_z, wih_n   (lane 0 = 0)
                               row 3..4 : b_r = bih_r+bhh_r, b_z = bih_z+bhh_z
                               row 5    : bih_n
                               row 6..8 : whh_r, whh_z, whh_n
                               row 9    : bhh_n
                               row 10..12: W_ih_l0 for gates r, z, n on lanes 0..D-1
    out_ref: (Bp, LANE_PAD)    final wavefront state; lane NUM_LAYERS-1 = top-layer last-step h
    """
    B, T, D = x_ref.shape
    lanes = pp_ref.shape[1]

    x = x_ref[...]                                                   # (B, T, D) f32

    def row(i):
        return pp_ref[i:i + 1, :]                                    # (1, lanes)

    wih_r, wih_z, wih_n = row(0), row(1), row(2)
    b_r, b_z, bih_n = row(3), row(4), row(5)
    whh_r, whh_z, whh_n = row(6), row(7), row(8)
    bhh_n = row(9)

    lane = jax.lax.broadcasted_iota(jnp.int32, (1, lanes), 1)
    is_l0 = lane == 0                                                # layer-0 lane mask

    # ---- layer-0 input projection for ALL time steps, hoisted off the recurrence ----
    # gbt[g][b, t] = sum_d x[b, t, d] * W_ih_l0[g, d]; then deposited in lane 0 per step.
    gbt = [jnp.sum(x * pp_ref[10 + g:11 + g, 0:D], axis=-1) for g in range(3)]   # 3 x (B, T)
    gx0 = [[jnp.where(is_l0, gbt[g][:, t:t + 1], 0.0) for g in range(3)]
           for t in range(T)]                                        # T x 3 x (B, lanes)

    def sigm(v):                                                     # sigmoid = one EUP tanh
        return 0.5 * jnp.tanh(0.5 * v) + 0.5

    h = jnp.zeros((B, lanes), jnp.float32)                           # lane l = h of layer l

    n_steps = T + NUM_LAYERS - 1                                     # 13 steps, static unroll
    for s in range(n_steps):
        t0 = min(s, T - 1)                                           # static layer-0 time index
        gx_r, gx_z, gx_n = gx0[t0]
        # layer l consumes layer l-1's hidden from the previous wavefront step
        x_in = pltpu.roll(h, shift=1, axis=1)                        # out[l] = in[l-1] (XLU)
        gr = x_in * wih_r + gx_r + b_r                               # lane 0: wih_r = 0
        gz = x_in * wih_z + gx_z + b_z
        gn = x_in * wih_n + gx_n + bih_n
        r = sigm(gr + h * whh_r)                                     # bhh_r folded into b_r
        z = sigm(gz + h * whh_z)                                     # bhh_z folded into b_z
        n = jnp.tanh(gn + r * (h * whh_n + bhh_n))
        h_new = n + z * (h - n)                                      # (1 - z) * n + z * h
        if s < NUM_LAYERS - 1:                                       # layer l starts at step s = l
            h = jnp.where(lane <= s, h_new, h)
        else:
            h = h_new

    out_ref[...] = h                                                 # lane-dense full-h store


def pack_params(params):
    """Pack all GRU parameters into one (N_ROWS, LANE_PAD) f32 buffer (layers on lanes)."""
    wih0, bih0, wihr, bihr, whh, bhh = params
    D = wih0.shape[0]
    wih_rows = jnp.concatenate([jnp.zeros((1, 3), jnp.float32), wihr], axis=0)   # (6,3), l0 zeroed
    bih_rows = jnp.concatenate([bih0, bihr], axis=0)                             # (6,3)
    b_r = bih_rows[:, 0] + bhh[:, 0]                                             # folded r bias
    b_z = bih_rows[:, 1] + bhh[:, 1]                                             # folded z bias
    rows6 = jnp.stack([
        wih_rows[:, 0], wih_rows[:, 1], wih_rows[:, 2],
        b_r, b_z, bih_rows[:, 2],
        whh[:, 0], whh[:, 1], whh[:, 2],
        bhh[:, 2],
    ], axis=0)                                                                   # (10, 6)
    rows6 = jnp.pad(rows6, ((0, 0), (0, LANE_PAD - NUM_LAYERS)))
    rows_w0 = jnp.pad(wih0.T, ((0, 0), (0, LANE_PAD - D)))                       # (3, 128)
    pad = jnp.zeros((N_ROWS - rows6.shape[0] - rows_w0.shape[0], LANE_PAD), jnp.float32)
    return jnp.concatenate([rows6, rows_w0, pad], axis=0).astype(jnp.float32)    # (16, 128)


@jax.jit
def model03_forward(x, params):
    """x: (B, T, D) batch_first, like the PyTorch module. Returns (B,) = y[:, -1, 0]."""
    B, T, D = x.shape
    packed = pack_params(params)

    b_pad = (-B) % SUBLANE                                           # pad batch to full sublanes
    x_p = jnp.pad(x.astype(jnp.float32), ((0, b_pad), (0, 0), (0, 0)))

    out = pl.pallas_call(
        gru_wavefront_kernel,
        out_shape=jax.ShapeDtypeStruct((B + b_pad, LANE_PAD), jnp.float32),
        in_specs=[pl.BlockSpec(memory_space=pltpu.MemorySpace.VMEM)] * 2,
        out_specs=pl.BlockSpec(memory_space=pltpu.MemorySpace.VMEM),
    )(x_p, packed)
    return out[:B, NUM_LAYERS - 1]                                   # top layer, last time step


def init_gru_params(key, data_dim):
    """PyTorch nn.GRU init: U(-1/sqrt(H), 1/sqrt(H)); H=1 -> U(-1, 1). Gate order r,z,n."""
    ks = jax.random.split(key, 6)
    u = lambda k, shape: jax.random.uniform(k, shape, jnp.float32, -1.0, 1.0)
    wih0 = u(ks[0], (data_dim, 3))          # weight_ih_l0^T  (D, 3)
    bih0 = u(ks[1], (1, 3))                 # bias_ih_l0
    wihr = u(ks[2], (NUM_LAYERS - 1, 3))    # weight_ih_l{1..5} (input size 1)
    bihr = u(ks[3], (NUM_LAYERS - 1, 3))
    whh = u(ks[4], (NUM_LAYERS, 3))         # weight_hh_l{0..5} (hidden size 1)
    bhh = u(ks[5], (NUM_LAYERS, 3))
    return wih0, bih0, wihr, bihr, whh, bhh


def model03_reference(x, params):
    """Pure-JAX reference of the 6-layer GRU (eval mode), PyTorch gate equations."""
    wih0, bih0, wihr, bihr, whh, bhh = params
    B, T, D = x.shape
    seq = x.astype(jnp.float32)
    for l in range(NUM_LAYERS):
        h = jnp.zeros((B, 1), jnp.float32)
        outs = []
        for t in range(T):
            if l == 0:
                gx = seq[:, t, :] @ wih0 + bih0
            else:
                gx = seq[:, t, :] * wihr[l - 1:l, :] + bihr[l - 1:l, :]
            gh = h * whh[l:l + 1, :] + bhh[l:l + 1, :]
            r = jax.nn.sigmoid(gx[:, 0:1] + gh[:, 0:1])
            z = jax.nn.sigmoid(gx[:, 1:2] + gh[:, 1:2])
            n = jnp.tanh(gx[:, 2:3] + r * gh[:, 2:3])
            h = (1.0 - z) * n + z * h
            outs.append(h)
        seq = jnp.stack(outs, axis=1)       # (B, T, 1)
    return seq[:, -1, 0]


if __name__ == "__main__":
    key = jax.random.PRNGKey(0)
    k_x, k_p = jax.random.split(key)

    B, T, D = 4, 8, DATA_DIMENSION
    x = jax.random.normal(k_x, (B, T, D), jnp.float32)
    params = init_gru_params(k_p, D)

    y = jax.block_until_ready(model03_forward(x, params))
    y_ref = model03_reference(x, params)

    assert y.shape == (B,), y.shape
    assert jnp.allclose(y, y_ref, atol=1e-4, rtol=1e-4), (y, y_ref)
    print("KERNEL_OK")
</pallas_src>

<mosaic_0001>
module attributes {stable_mosaic.version = 11 : i64} {
  func.func @gru_wavefront_kernel(%arg0: memref<8x8x8xf32, #tpu.memory_space<vmem>>, %arg1: memref<16x128xf32, #tpu.memory_space<vmem>>, %arg2: memref<8x128xf32, #tpu.memory_space<vmem>>) attributes {dimension_semantics = [], scalar_prefetch = 0 : i64, scratch_operands = 0 : i64, tpu.core_type = #tpu.core_type<tc>} {
    %c0 = arith.constant 0 : index
    %c0_0 = arith.constant 0 : index
    %c0_1 = arith.constant 0 : index
    %0 = vector.load %arg0[%c0, %c0_0, %c0_1] : memref<8x8x8xf32, #tpu.memory_space<vmem>>, vector<8x8x8xf32>
    %c0_2 = arith.constant 0 : index
    %c0_3 = arith.constant 0 : index
    %1 = vector.load %arg1[%c0_2, %c0_3] : memref<16x128xf32, #tpu.memory_space<vmem>>, vector<1x128xf32>
    %c1 = arith.constant 1 : index
    %c0_4 = arith.constant 0 : index
    %2 = vector.load %arg1[%c1, %c0_4] : memref<16x128xf32, #tpu.memory_space<vmem>>, vector<1x128xf32>
    %c2 = arith.constant 2 : index
    %c0_5 = arith.constant 0 : index
    %3 = vector.load %arg1[%c2, %c0_5] : memref<16x128xf32, #tpu.memory_space<vmem>>, vector<1x128xf32>
    %c3 = arith.constant 3 : index
    %c0_6 = arith.constant 0 : index
    %4 = vector.load %arg1[%c3, %c0_6] : memref<16x128xf32, #tpu.memory_space<vmem>>, vector<1x128xf32>
    %c4 = arith.constant 4 : index
    %c0_7 = arith.constant 0 : index
    %5 = vector.load %arg1[%c4, %c0_7] : memref<16x128xf32, #tpu.memory_space<vmem>>, vector<1x128xf32>
    %c5 = arith.constant 5 : index
    %c0_8 = arith.constant 0 : index
    %6 = vector.load %arg1[%c5, %c0_8] : memref<16x128xf32, #tpu.memory_space<vmem>>, vector<1x128xf32>
    %c6 = arith.constant 6 : index
    %c0_9 = arith.constant 0 : index
    %7 = vector.load %arg1[%c6, %c0_9] : memref<16x128xf32, #tpu.memory_space<vmem>>, vector<1x128xf32>
    %c7 = arith.constant 7 : index
    %c0_10 = arith.constant 0 : index
    %8 = vector.load %arg1[%c7, %c0_10] : memref<16x128xf32, #tpu.memory_space<vmem>>, vector<1x128xf32>
    %c8 = arith.constant 8 : index
    %c0_11 = arith.constant 0 : index
    %9 = vector.load %arg1[%c8, %c0_11] : memref<16x128xf32, #tpu.memory_space<vmem>>, vector<1x128xf32>
    %c9 = arith.constant 9 : index
    %c0_12 = arith.constant 0 : index
    %10 = vector.load %arg1[%c9, %c0_12] : memref<16x128xf32, #tpu.memory_space<vmem>>, vector<1x128xf32>
    %11 = tpu.iota {dimensions = array<i32: 1>} : vector<1x128xi32>
    %c0_i32 = arith.constant 0 : i32
    %12 = vector.broadcast %c0_i32 : i32 to vector<1x128xi32>
    %13 = arith.cmpi eq, %11, %12 : vector<1x128xi32>
    %c10 = arith.constant 10 : index
    %c0_13 = arith.constant 0 : index
    %14 = vector.load %arg1[%c10, %c0_13] : memref<16x128xf32, #tpu.memory_space<vmem>>, vector<1x8xf32>
    %15 = vector.shape_cast %14 : vector<1x8xf32> to vector<1x1x8xf32>
    %16 = vector.broadcast %15 : vector<1x1x8xf32> to vector<8x8x8xf32>
    %17 = arith.mulf %0, %16 : vector<8x8x8xf32>
    %cst = arith.constant dense<0.000000e+00> : vector<8x8xf32>
    %18 = vector.multi_reduction <add>, %17, %cst [2] : vector<8x8x8xf32> to vector<8x8xf32>
    %c11 = arith.constant 11 : index
    %c0_14 = arith.constant 0 : index
    %19 = vector.load %arg1[%c11, %c0_14] : memref<16x128xf32, #tpu.memory_space<vmem>>, vector<1x8xf32>
    %20 = vector.shape_cast %19 : vector<1x8xf32> to vector<1x1x8xf32>
    %21 = vector.broadcast %20 : vector<1x1x8xf32> to vector<8x8x8xf32>
    %22 = arith.mulf %0, %21 : vector<8x8x8xf32>
    %cst_15 = arith.constant dense<0.000000e+00> : vector<8x8xf32>
    %23 = vector.multi_reduction <add>, %22, %cst_15 [2] : vector<8x8x8xf32> to vector<8x8xf32>
    %c12 = arith.constant 12 : index
    %c0_16 = arith.constant 0 : index
    %24 = vector.load %arg1[%c12, %c0_16] : memref<16x128xf32, #tpu.memory_space<vmem>>, vector<1x8xf32>
    %25 = vector.shape_cast %24 : vector<1x8xf32> to vector<1x1x8xf32>
    %26 = vector.broadcast %25 : vector<1x1x8xf32> to vector<8x8x8xf32>
    %27 = arith.mulf %0, %26 : vector<8x8x8xf32>
    %cst_17 = arith.constant dense<0.000000e+00> : vector<8x8xf32>
    %28 = vector.multi_reduction <add>, %27, %cst_17 [2] : vector<8x8x8xf32> to vector<8x8xf32>
    %29 = vector.extract_strided_slice %18 {offsets = [0, 0], sizes = [8, 1], strides = [1, 1]} : vector<8x8xf32> to vector<8x1xf32>
    %cst_18 = arith.constant 0.000000e+00 : f32
    %30 = vector.shape_cast %13 : vector<1x128xi1> to vector<1x128xi1>
    %31 = vector.broadcast %30 : vector<1x128xi1> to vector<8x128xi1>
    %32 = vector.shape_cast %29 : vector<8x1xf32> to vector<8x1xf32>
    %33 = vector.broadcast %32 : vector<8x1xf32> to vector<8x128xf32>
    %34 = vector.broadcast %cst_18 : f32 to vector<8x128xf32>
    %35 = arith.select %31, %33, %34 : vector<8x128xi1>, vector<8x128xf32>
    %36 = vector.extract_strided_slice %23 {offsets = [0, 0], sizes = [8, 1], strides = [1, 1]} : vector<8x8xf32> to vector<8x1xf32>
    %cst_19 = arith.constant 0.000000e+00 : f32
    %37 = vector.shape_cast %13 : vector<1x128xi1> to vector<1x128xi1>
    %38 = vector.broadcast %37 : vector<1x128xi1> to vector<8x128xi1>
    %39 = vector.shape_cast %36 : vector<8x1xf32> to vector<8x1xf32>
    %40 = vector.broadcast %39 : vector<8x1xf32> to vector<8x128xf32>
    %41 = vector.broadcast %cst_19 : f32 to vector<8x128xf32>
    %42 = arith.select %38, %40, %41 : vector<8x128xi1>, vector<8x128xf32>
    %43 = vector.extract_strided_slice %28 {offsets = [0, 0], sizes = [8, 1], strides = [1, 1]} : vector<8x8xf32> to vector<8x1xf32>
    %cst_20 = arith.constant 0.000000e+00 : f32
    %44 = vector.shape_cast %13 : vector<1x128xi1> to vector<1x128xi1>
    %45 = vector.broadcast %44 : vector<1x128xi1> to vector<8x128xi1>
    %46 = vector.shape_cast %43 : vector<8x1xf32> to vector<8x1xf32>
    %47 = vector.broadcast %46 : vector<8x1xf32> to vector<8x128xf32>
    %48 = vector.broadcast %cst_20 : f32 to vector<8x128xf32>
    %49 = arith.select %45, %47, %48 : vector<8x128xi1>, vector<8x128xf32>
    %50 = vector.extract_strided_slice %18 {offsets = [0, 1], sizes = [8, 1], strides = [1, 1]} : vector<8x8xf32> to vector<8x1xf32>
    %cst_21 = arith.constant 0.000000e+00 : f32
    %51 = vector.shape_cast %13 : vector<1x128xi1> to vector<1x128xi1>
    %52 = vector.broadcast %51 : vector<1x128xi1> to vector<8x128xi1>
    %53 = vector.shape_cast %50 : vector<8x1xf32> to vector<8x1xf32>
    %54 = vector.broadcast %53 : vector<8x1xf32> to vector<8x128xf32>
    %55 = vector.broadcast %cst_21 : f32 to vector<8x128xf32>
    %56 = arith.select %52, %54, %55 : vector<8x128xi1>, vector<8x128xf32>
    %57 = vector.extract_strided_slice %23 {offsets = [0, 1], sizes = [8, 1], strides = [1, 1]} : vector<8x8xf32> to vector<8x1xf32>
    %cst_22 = arith.constant 0.000000e+00 : f32
    %58 = vector.shape_cast %13 : vector<1x128xi1> to vector<1x128xi1>
    %59 = vector.broadcast %58 : vector<1x128xi1> to vector<8x128xi1>
    %60 = vector.shape_cast %57 : vector<8x1xf32> to vector<8x1xf32>
    %61 = vector.broadcast %60 : vector<8x1xf32> to vector<8x128xf32>
    %62 = vector.broadcast %cst_22 : f32 to vector<8x128xf32>
    %63 = arith.select %59, %61, %62 : vector<8x128xi1>, vector<8x128xf32>
    %64 = vector.extract_strided_slice %28 {offsets = [0, 1], sizes = [8, 1], strides = [1, 1]} : vector<8x8xf32> to vector<8x1xf32>
    %cst_23 = arith.constant 0.000000e+00 : f32
    %65 = vector.shape_cast %13 : vector<1x128xi1> to vector<1x128xi1>
    %66 = vector.broadcast %65 : vector<1x128xi1> to vector<8x128xi1>
    %67 = vector.shape_cast %64 : vector<8x1xf32> to vector<8x1xf32>
    %68 = vector.broadcast %67 : vector<8x1xf32> to vector<8x128xf32>
    %69 = vector.broadcast %cst_23 : f32 to vector<8x128xf32>
    %70 = arith.select %66, %68, %69 : vector<8x128xi1>, vector<8x128xf32>
    %71 = vector.extract_strided_slice %18 {offsets = [0, 2], sizes = [8, 1], strides = [1, 1]} : vector<8x8xf32> to vector<8x1xf32>
    %cst_24 = arith.constant 0.000000e+00 : f32
    %72 = vector.shape_cast %13 : vector<1x128xi1> to vector<1x128xi1>
    %73 = vector.broadcast %72 : vector<1x128xi1> to vector<8x128xi1>
    %74 = vector.shape_cast %71 : vector<8x1xf32> to vector<8x1xf32>
    %75 = vector.broadcast %74 : vector<8x1xf32> to vector<8x128xf32>
    %76 = vector.broadcast %cst_24 : f32 to vector<8x128xf32>
    %77 = arith.select %73, %75, %76 : vector<8x128xi1>, vector<8x128xf32>
    %78 = vector.extract_strided_slice %23 {offsets = [0, 2], sizes = [8, 1], strides = [1, 1]} : vector<8x8xf32> to vector<8x1xf32>
    %cst_25 = arith.constant 0.000000e+00 : f32
    %79 = vector.shape_cast %13 : vector<1x128xi1> to vector<1x128xi1>
    %80 = vector.broadcast %79 : vector<1x128xi1> to vector<8x128xi1>
    %81 = vector.shape_cast %78 : vector<8x1xf32> to vector<8x1xf32>
    %82 = vector.broadcast %81 : vector<8x1xf32> to vector<8x128xf32>
    %83 = vector.broadcast %cst_25 : f32 to vector<8x128xf32>
    %84 = arith.select %80, %82, %83 : vector<8x128xi1>, vector<8x128xf32>
    %85 = vector.extract_strided_slice %28 {offsets = [0, 2], sizes = [8, 1], strides = [1, 1]} : vector<8x8xf32> to vector<8x1xf32>
    %cst_26 = arith.constant 0.000000e+00 : f32
    %86 = vector.shape_cast %13 : vector<1x128xi1> to vector<1x128xi1>
    %87 = vector.broadcast %86 : vector<1x128xi1> to vector<8x128xi1>
    %88 = vector.shape_cast %85 : vector<8x1xf32> to vector<8x1xf32>
    %89 = vector.broadcast %88 : vector<8x1xf32> to vector<8x128xf32>
    %90 = vector.broadcast %cst_26 : f32 to vector<8x128xf32>
    %91 = arith.select %87, %89, %90 : vector<8x128xi1>, vector<8x128xf32>
    %92 = vector.extract_strided_slice %18 {offsets = [0, 3], sizes = [8, 1], strides = [1, 1]} : vector<8x8xf32> to vector<8x1xf32>
    %cst_27 = arith.constant 0.000000e+00 : f32
    %93 = vector.shape_cast %13 : vector<1x128xi1> to vector<1x128xi1>
    %94 = vector.broadcast %93 : vector<1x128xi1> to vector<8x128xi1>
    %95 = vector.shape_cast %92 : vector<8x1xf32> to vector<8x1xf32>
    %96 = vector.broadcast %95 : vector<8x1xf32> to vector<8x128xf32>
    %97 = vector.broadcast %cst_27 : f32 to vector<8x128xf32>
    %98 = arith.select %94, %96, %97 : vector<8x128xi1>, vector<8x128xf32>
    %99 = vector.extract_strided_slice %23 {offsets = [0, 3], sizes = [8, 1], strides = [1, 1]} : vector<8x8xf32> to vector<8x1xf32>
    %cst_28 = arith.constant 0.000000e+00 : f32
    %100 = vector.shape_cast %13 : vector<1x128xi1> to vector<1x128xi1>
    %101 = vector.broadcast %100 : vector<1x128xi1> to vector<8x128xi1>
    %102 = vector.shape_cast %99 : vector<8x1xf32> to vector<8x1xf32>
    %103 = vector.broadcast %102 : vector<8x1xf32> to vector<8x128xf32>
    %104 = vector.broadcast %cst_28 : f32 to vector<8x128xf32>
    %105 = arith.select %101, %103, %104 : vector<8x128xi1>, vector<8x128xf32>
    %106 = vector.extract_strided_slice %28 {offsets = [0, 3], sizes = [8, 1], strides = [1, 1]} : vector<8x8xf32> to vector<8x1xf32>
    %cst_29 = arith.constant 0.000000e+00 : f32
    %107 = vector.shape_cast %13 : vector<1x128xi1> to vector<1x128xi1>
    %108 = vector.broadcast %107 : vector<1x128xi1> to vector<8x128xi1>
    %109 = vector.shape_cast %106 : vector<8x1xf32> to vector<8x1xf32>
    %110 = vector.broadcast %109 : vector<8x1xf32> to vector<8x128xf32>
    %111 = vector.broadcast %cst_29 : f32 to vector<8x128xf32>
    %112 = arith.select %108, %110, %111 : vector<8x128xi1>, vector<8x128xf32>
    %113 = vector.extract_strided_slice %18 {offsets = [0, 4], sizes = [8, 1], strides = [1, 1]} : vector<8x8xf32> to vector<8x1xf32>
    %cst_30 = arith.constant 0.000000e+00 : f32
    %114 = vector.shape_cast %13 : vector<1x128xi1> to vector<1x128xi1>
    %115 = vector.broadcast %114 : vector<1x128xi1> to vector<8x128xi1>
    %116 = vector.shape_cast %113 : vector<8x1xf32> to vector<8x1xf32>
    %117 = vector.broadcast %116 : vector<8x1xf32> to vector<8x128xf32>
    %118 = vector.broadcast %cst_30 : f32 to vector<8x128xf32>
    %119 = arith.select %115, %117, %118 : vector<8x128xi1>, vector<8x128xf32>
    %120 = vector.extract_strided_slice %23 {offsets = [0, 4], sizes = [8, 1], strides = [1, 1]} : vector<8x8xf32> to vector<8x1xf32>
    %cst_31 = arith.constant 0.000000e+00 : f32
    %121 = vector.shape_cast %13 : vector<1x128xi1> to vector<1x128xi1>
    %122 = vector.broadcast %121 : vector<1x128xi1> to vector<8x128xi1>
    %123 = vector.shape_cast %120 : vector<8x1xf32> to vector<8x1xf32>
    %124 = vector.broadcast %123 : vector<8x1xf32> to vector<8x128xf32>
    %125 = vector.broadcast %cst_31 : f32 to vector<8x128xf32>
    %126 = arith.select %122, %124, %125 : vector<8x128xi1>, vector<8x128xf32>
    %127 = vector.extract_strided_slice %28 {offsets = [0, 4], sizes = [8, 1], strides = [1, 1]} : vector<8x8xf32> to vector<8x1xf32>
    %cst_32 = arith.constant 0.000000e+00 : f32
    %128 = vector.shape_cast %13 : vector<1x128xi1> to vector<1x128xi1>
    %129 = vector.broadcast %128 : vector<1x128xi1> to vector<8x128xi1>
    %130 = vector.shape_cast %127 : vector<8x1xf32> to vector<8x1xf32>
    %131 = vector.broadcast %130 : vector<8x1xf32> to vector<8x128xf32>
    %132 = vector.broadcast %cst_32 : f32 to vector<8x128xf32>
    %133 = arith.select %129, %131, %132 : vector<8x128xi1>, vector<8x128xf32>
    %134 = vector.extract_strided_slice %18 {offsets = [0, 5], sizes = [8, 1], strides = [1, 1]} : vector<8x8xf32> to vector<8x1xf32>
    %cst_33 = arith.constant 0.000000e+00 : f32
    %135 = vector.shape_cast %13 : vector<1x128xi1> to vector<1x128xi1>
    %136 = vector.broadcast %135 : vector<1x128xi1> to vector<8x128xi1>
    %137 = vector.shape_cast %134 : vector<8x1xf32> to vector<8x1xf32>
    %138 = vector.broadcast %137 : vector<8x1xf32> to vector<8x128xf32>
    %139 = vector.broadcast %cst_33 : f32 to vector<8x128xf32>
    %140 = arith.select %136, %138, %139 : vector<8x128xi1>, vector<8x128xf32>
    %141 = vector.extract_strided_slice %23 {offsets = [0, 5], sizes = [8, 1], strides = [1, 1]} : vector<8x8xf32> to vector<8x1xf32>
    %cst_34 = arith.constant 0.000000e+00 : f32
    %142 = vector.shape_cast %13 : vector<1x128xi1> to vector<1x128xi1>
    %143 = vector.broadcast %142 : vector<1x128xi1> to vector<8x128xi1>
    %144 = vector.shape_cast %141 : vector<8x1xf32> to vector<8x1xf32>
    %145 = vector.broadcast %144 : vector<8x1xf32> to vector<8x128xf32>
    %146 = vector.broadcast %cst_34 : f32 to vector<8x128xf32>
    %147 = arith.select %143, %145, %146 : vector<8x128xi1>, vector<8x128xf32>
    %148 = vector.extract_strided_slice %28 {offsets = [0, 5], sizes = [8, 1], strides = [1, 1]} : vector<8x8xf32> to vector<8x1xf32>
    %cst_35 = arith.constant 0.000000e+00 : f32
    %149 = vector.shape_cast %13 : vector<1x128xi1> to vector<1x128xi1>
    %150 = vector.broadcast %149 : vector<1x128xi1> to vector<8x128xi1>
    %151 = vector.shape_cast %148 : vector<8x1xf32> to vector<8x1xf32>
    %152 = vector.broadcast %151 : vector<8x1xf32> to vector<8x128xf32>
    %153 = vector.broadcast %cst_35 : f32 to vector<8x128xf32>
    %154 = arith.select %150, %152, %153 : vector<8x128xi1>, vector<8x128xf32>
    %155 = vector.extract_strided_slice %18 {offsets = [0, 6], sizes = [8, 1], strides = [1, 1]} : vector<8x8xf32> to vector<8x1xf32>
    %cst_36 = arith.constant 0.000000e+00 : f32
    %156 = vector.shape_cast %13 : vector<1x128xi1> to vector<1x128xi1>
    %157 = vector.broadcast %156 : vector<1x128xi1> to vector<8x128xi1>
    %158 = vector.shape_cast %155 : vector<8x1xf32> to vector<8x1xf32>
    %159 = vector.broadcast %158 : vector<8x1xf32> to vector<8x128xf32>
    %160 = vector.broadcast %cst_36 : f32 to vector<8x128xf32>
    %161 = arith.select %157, %159, %160 : vector<8x128xi1>, vector<8x128xf32>
    %162 = vector.extract_strided_slice %23 {offsets = [0, 6], sizes = [8, 1], strides = [1, 1]} : vector<8x8xf32> to vector<8x1xf32>
    %cst_37 = arith.constant 0.000000e+00 : f32
    %163 = vector.shape_cast %13 : vector<1x128xi1> to vector<1x128xi1>
    %164 = vector.broadcast %163 : vector<1x128xi1> to vector<8x128xi1>
    %165 = vector.shape_cast %162 : vector<8x1xf32> to vector<8x1xf32>
    %166 = vector.broadcast %165 : vector<8x1xf32> to vector<8x128xf32>
    %167 = vector.broadcast %cst_37 : f32 to vector<8x128xf32>
    %168 = arith.select %164, %166, %167 : vector<8x128xi1>, vector<8x128xf32>
    %169 = vector.extract_strided_slice %28 {offsets = [0, 6], sizes = [8, 1], strides = [1, 1]} : vector<8x8xf32> to vector<8x1xf32>
    %cst_38 = arith.constant 0.000000e+00 : f32
    %170 = vector.shape_cast %13 : vector<1x128xi1> to vector<1x128xi1>
    %171 = vector.broadcast %170 : vector<1x128xi1> to vector<8x128xi1>
    %172 = vector.shape_cast %169 : vector<8x1xf32> to vector<8x1xf32>
    %173 = vector.broadcast %172 : vector<8x1xf32> to vector<8x128xf32>
    %174 = vector.broadcast %cst_38 : f32 to vector<8x128xf32>
    %175 = arith.select %171, %173, %174 : vector<8x128xi1>, vector<8x128xf32>
    %176 = vector.extract_strided_slice %18 {offsets = [0, 7], sizes = [8, 1], strides = [1, 1]} : vector<8x8xf32> to vector<8x1xf32>
    %cst_39 = arith.constant 0.000000e+00 : f32
    %177 = vector.shape_cast %13 : vector<1x128xi1> to vector<1x128xi1>
    %178 = vector.broadcast %177 : vector<1x128xi1> to vector<8x128xi1>
    %179 = vector.shape_cast %176 : vector<8x1xf32> to vector<8x1xf32>
    %180 = vector.broadcast %179 : vector<8x1xf32> to vector<8x128xf32>
    %181 = vector.broadcast %cst_39 : f32 to vector<8x128xf32>
    %182 = arith.select %178, %180, %181 : vector<8x128xi1>, vector<8x128xf32>
    %183 = vector.extract_strided_slice %23 {offsets = [0, 7], sizes = [8, 1], strides = [1, 1]} : vector<8x8xf32> to vector<8x1xf32>
    %cst_40 = arith.constant 0.000000e+00 : f32
    %184 = vector.shape_cast %13 : vector<1x128xi1> to vector<1x128xi1>
    %185 = vector.broadcast %184 : vector<1x128xi1> to vector<8x128xi1>
    %186 = vector.shape_cast %183 : vector<8x1xf32> to vector<8x1xf32>
    %187 = vector.broadcast %186 : vector<8x1xf32> to vector<8x128xf32>
    %188 = vector.broadcast %cst_40 : f32 to vector<8x128xf32>
    %189 = arith.select %185, %187, %188 : vector<8x128xi1>, vector<8x128xf32>
    %190 = vector.extract_strided_slice %28 {offsets = [0, 7], sizes = [8, 1], strides = [1, 1]} : vector<8x8xf32> to vector<8x1xf32>
    %cst_41 = arith.constant 0.000000e+00 : f32
    %191 = vector.shape_cast %13 : vector<1x128xi1> to vector<1x128xi1>
    %192 = vector.broadcast %191 : vector<1x128xi1> to vector<8x128xi1>
    %193 = vector.shape_cast %190 : vector<8x1xf32> to vector<8x1xf32>
    %194 = vector.broadcast %193 : vector<8x1xf32> to vector<8x128xf32>
    %195 = vector.broadcast %cst_41 : f32 to vector<8x128xf32>
    %196 = arith.select %192, %194, %195 : vector<8x128xi1>, vector<8x128xf32>
    %cst_42 = arith.constant 0.000000e+00 : f32
    %197 = vector.broadcast %cst_42 : f32 to vector<8x128xf32>
    %c1_i32 = arith.constant 1 : i32
    %198 = tpu.dynamic_rotate %197 by %c1_i32 dim 1 : vector<8x128xf32>, i32 -> vector<8x128xf32>
    %199 = vector.broadcast %1 : vector<1x128xf32> to vector<8x128xf32>
    %200 = arith.mulf %198, %199 : vector<8x128xf32>
    %201 = arith.addf %200, %35 : vector<8x128xf32>
    %202 = vector.broadcast %4 : vector<1x128xf32> to vector<8x128xf32>
    %203 = arith.addf %201, %202 : vector<8x128xf32>
    %204 = vector.broadcast %2 : vector<1x128xf32> to vector<8x128xf32>
    %205 = arith.mulf %198, %204 : vector<8x128xf32>
    %206 = arith.addf %205, %42 : vector<8x128xf32>
    %207 = vector.broadcast %5 : vector<1x128xf32> to vector<8x128xf32>
    %208 = arith.addf %206, %207 : vector<8x128xf32>
    %209 = vector.broadcast %3 : vector<1x128xf32> to vector<8x128xf32>
    %210 = arith.mulf %198, %209 : vector<8x128xf32>
    %211 = arith.addf %210, %49 : vector<8x128xf32>
    %212 = vector.broadcast %6 : vector<1x128xf32> to vector<8x128xf32>
    %213 = arith.addf %211, %212 : vector<8x128xf32>
    %214 = vector.broadcast %7 : vector<1x128xf32> to vector<8x128xf32>
    %215 = arith.mulf %197, %214 : vector<8x128xf32>
    %216 = arith.addf %203, %215 : vector<8x128xf32>
    %cst_43 = arith.constant 5.000000e-01 : f32
    %217 = vector.broadcast %cst_43 : f32 to vector<8x128xf32>
    %218 = arith.mulf %217, %216 : vector<8x128xf32>
    %219 = math.tanh %218 : vector<8x128xf32>
    %cst_44 = arith.constant 5.000000e-01 : f32
    %220 = vector.broadcast %cst_44 : f32 to vector<8x128xf32>
    %221 = arith.mulf %220, %219 : vector<8x128xf32>
    %cst_45 = arith.constant 5.000000e-01 : f32
    %222 = vector.broadcast %cst_45 : f32 to vector<8x128xf32>
    %223 = arith.addf %221, %222 : vector<8x128xf32>
    %224 = vector.broadcast %8 : vector<1x128xf32> to vector<8x128xf32>
    %225 = arith.mulf %197, %224 : vector<8x128xf32>
    %226 = arith.addf %208, %225 : vector<8x128xf32>
    %cst_46 = arith.constant 5.000000e-01 : f32
    %227 = vector.broadcast %cst_46 : f32 to vector<8x128xf32>
    %228 = arith.mulf %227, %226 : vector<8x128xf32>
    %229 = math.tanh %228 : vector<8x128xf32>
    %cst_47 = arith.constant 5.000000e-01 : f32
    %230 = vector.broadcast %cst_47 : f32 to vector<8x128xf32>
    %231 = arith.mulf %230, %229 : vector<8x128xf32>
    %cst_48 = arith.constant 5.000000e-01 : f32
    %232 = vector.broadcast %cst_48 : f32 to vector<8x128xf32>
    %233 = arith.addf %231, %232 : vector<8x128xf32>
    %234 = vector.broadcast %9 : vector<1x128xf32> to vector<8x128xf32>
    %235 = arith.mulf %197, %234 : vector<8x128xf32>
    %236 = vector.broadcast %10 : vector<1x128xf32> to vector<8x128xf32>
    %237 = arith.addf %235, %236 : vector<8x128xf32>
    %238 = arith.mulf %223, %237 : vector<8x128xf32>
    %239 = arith.addf %213, %238 : vector<8x128xf32>
    %240 = math.tanh %239 : vector<8x128xf32>
    %241 = arith.subf %197, %240 : vector<8x128xf32>
    %242 = arith.mulf %233, %241 : vector<8x128xf32>
    %243 = arith.addf %240, %242 : vector<8x128xf32>
    %c0_i32_49 = arith.constant 0 : i32
    %244 = vector.broadcast %c0_i32_49 : i32 to vector<1x128xi32>
    %245 = arith.cmpi sle, %11, %244 : vector<1x128xi32>
    %246 = vector.shape_cast %245 : vector<1x128xi1> to vector<1x128xi1>
    %247 = vector.broadcast %246 : vector<1x128xi1> to vector<8x128xi1>
    %248 = arith.select %247, %243, %197 : vector<8x128xi1>, vector<8x128xf32>
    %c1_i32_50 = arith.constant 1 : i32
    %249 = tpu.dynamic_rotate %248 by %c1_i32_50 dim 1 : vector<8x128xf32>, i32 -> vector<8x128xf32>
    %250 = vector.broadcast %1 : vector<1x128xf32> to vector<8x128xf32>
    %251 = arith.mulf %249, %250 : vector<8x128xf32>
    %252 = arith.addf %251, %56 : vector<8x128xf32>
    %253 = vector.broadcast %4 : vector<1x128xf32> to vector<8x128xf32>
    %254 = arith.addf %252, %253 : vector<8x128xf32>
    %255 = vector.broadcast %2 : vector<1x128xf32> to vector<8x128xf32>
    %256 = arith.mulf %249, %255 : vector<8x128xf32>
    %257 = arith.addf %256, %63 : vector<8x128xf32>
    %258 = vector.broadcast %5 : vector<1x128xf32> to vector<8x128xf32>
    %259 = arith.addf %257, %258 : vector<8x128xf32>
    %260 = vector.broadcast %3 : vector<1x128xf32> to vector<8x128xf32>
    %261 = arith.mulf %249, %260 : vector<8x128xf32>
    %262 = arith.addf %261, %70 : vector<8x128xf32>
    %263 = vector.broadcast %6 : vector<1x128xf32> to vector<8x128xf32>
    %264 = arith.addf %262, %263 : vector<8x128xf32>
    %265 = vector.broadcast %7 : vector<1x128xf32> to vector<8x128xf32>
    %266 = arith.mulf %248, %265 : vector<8x128xf32>
    %267 = arith.addf %254, %266 : vector<8x128xf32>
    %cst_51 = arith.constant 5.000000e-01 : f32
    %268 = vector.broadcast %cst_51 : f32 to vector<8x128xf32>
    %269 = arith.mulf %268, %267 : vector<8x128xf32>
    %270 = math.tanh %269 : vector<8x128xf32>
    %cst_52 = arith.constant 5.000000e-01 : f32
    %271 = vector.broadcast %cst_52 : f32 to vector<8x128xf32>
    %272 = arith.mulf %271, %270 : vector<8x128xf32>
    %cst_53 = arith.constant 5.000000e-01 : f32
    %273 = vector.broadcast %cst_53 : f32 to vector<8x128xf32>
    %274 = arith.addf %272, %273 : vector<8x128xf32>
    %275 = vector.broadcast %8 : vector<1x128xf32> to vector<8x128xf32>
    %276 = arith.mulf %248, %275 : vector<8x128xf32>
    %277 = arith.addf %259, %276 : vector<8x128xf32>
    %cst_54 = arith.constant 5.000000e-01 : f32
    %278 = vector.broadcast %cst_54 : f32 to vector<8x128xf32>
    %279 = arith.mulf %278, %277 : vector<8x128xf32>
    %280 = math.tanh %279 : vector<8x128xf32>
    %cst_55 = arith.constant 5.000000e-01 : f32
    %281 = vector.broadcast %cst_55 : f32 to vector<8x128xf32>
    %282 = arith.mulf %281, %280 : vector<8x128xf32>
    %cst_56 = arith.constant 5.000000e-01 : f32
    %283 = vector.broadcast %cst_56 : f32 to vector<8x128xf32>
    %284 = arith.addf %282, %283 : vector<8x128xf32>
    %285 = vector.broadcast %9 : vector<1x128xf32> to vector<8x128xf32>
    %286 = arith.mulf %248, %285 : vector<8x128xf32>
    %287 = vector.broadcast %10 : vector<1x128xf32> to vector<8x128xf32>
    %288 = arith.addf %286, %287 : vector<8x128xf32>
    %289 = arith.mulf %274, %288 : vector<8x128xf32>
    %290 = arith.addf %264, %289 : vector<8x128xf32>
    %291 = math.tanh %290 : vector<8x128xf32>
    %292 = arith.subf %248, %291 : vector<8x128xf32>
    %293 = arith.mulf %284, %292 : vector<8x128xf32>
    %294 = arith.addf %291, %293 : vector<8x128xf32>
    %c1_i32_57 = arith.constant 1 : i32
    %295 = vector.broadcast %c1_i32_57 : i32 to vector<1x128xi32>
    %296 = arith.cmpi sle, %11, %295 : vector<1x128xi32>
    %297 = vector.shape_cast %296 : vector<1x128xi1> to vector<1x128xi1>
    %298 = vector.broadcast %297 : vector<1x128xi1> to vector<8x128xi1>
    %299 = arith.select %298, %294, %248 : vector<8x128xi1>, vector<8x128xf32>
    %c1_i32_58 = arith.constant 1 : i32
    %300 = tpu.dynamic_rotate %299 by %c1_i32_58 dim 1 : vector<8x128xf32>, i32 -> vector<8x128xf32>
    %301 = vector.broadcast %1 : vector<1x128xf32> to vector<8x128xf32>
    %302 = arith.mulf %300, %301 : vector<8x128xf32>
    %303 = arith.addf %302, %77 : vector<8x128xf32>
    %304 = vector.broadcast %4 : vector<1x128xf32> to vector<8x128xf32>
    %305 = arith.addf %303, %304 : vector<8x128xf32>
    %306 = vector.broadcast %2 : vector<1x128xf32> to vector<8x128xf32>
    %307 = arith.mulf %300, %306 : vector<8x128xf32>
    %308 = arith.addf %307, %84 : vector<8x128xf32>
    %309 = vector.broadcast %5 : vector<1x128xf32> to vector<8x128xf32>
    %310 = arith.addf %308, %309 : vector<8x128xf32>
    %311 = vector.broadcast %3 : vector<1x128xf32> to vector<8x128xf32>
    %312 = arith.mulf %300, %311 : vector<8x128xf32>
    %313 = arith.addf %312, %91 : vector<8x128xf32>
    %314 = vector.broadcast %6 : vector<1x128xf32> to vector<8x128xf32>
    %315 = arith.addf %313, %314 : vector<8x128xf32>
    %316 = vector.broadcast %7 : vector<1x128xf32> to vector<8x128xf32>
    %317 = arith.mulf %299, %316 : vector<8x128xf32>
    %318 = arith.addf %305, %317 : vector<8x128xf32>
    %cst_59 = arith.constant 5.000000e-01 : f32
    %319 = vector.broadcast %cst_59 : f32 to vector<8x128xf32>
    %320 = arith.mulf %319, %318 : vector<8x128xf32>
    %321 = math.tanh %320 : vector<8x128xf32>
    %cst_60 = arith.constant 5.000000e-01 : f32
    %322 = vector.broadcast %cst_60 : f32 to vector<8x128xf32>
    %323 = arith.mulf %322, %321 : vector<8x128xf32>
    %cst_61 = arith.constant 5.000000e-01 : f32
    %324 = vector.broadcast %cst_61 : f32 to vector<8x128xf32>
    %325 = arith.addf %323, %324 : vector<8x128xf32>
    %326 = vector.broadcast %8 : vector<1x128xf32> to vector<8x128xf32>
    %327 = arith.mulf %299, %326 : vector<8x128xf32>
    %328 = arith.addf %310, %327 : vector<8x128xf32>
    %cst_62 = arith.constant 5.000000e-01 : f32
    %329 = vector.broadcast %cst_62 : f32 to vector<8x128xf32>
    %330 = arith.mulf %329, %328 : vector<8x128xf32>
    %331 = math.tanh %330 : vector<8x128xf32>
    %cst_63 = arith.constant 5.000000e-01 : f32
    %332 = vector.broadcast %cst_63 : f32 to vector<8x128xf32>
    %333 = arith.mulf %332, %331 : vector<8x128xf32>
    %cst_64 = arith.constant 5.000000e-01 : f32
    %334 = vector.broadcast %cst_64 : f32 to vector<8x128xf32>
    %335 = arith.addf %333, %334 : vector<8x128xf32>
    %336 = vector.broadcast %9 : vector<1x128xf32> to vector<8x128xf32>
    %337 = arith.mulf %299, %336 : vector<8x128xf32>
    %338 = vector.broadcast %10 : vector<1x128xf32> to vector<8x128xf32>
    %339 = arith.addf %337, %338 : vector<8x128xf32>
    %340 = arith.mulf %325, %339 : vector<8x128xf32>
    %341 = arith.addf %315, %340 : vector<8x128xf32>
    %342 = math.tanh %341 : vector<8x128xf32>
    %343 = arith.subf %299, %342 : vector<8x128xf32>
    %344 = arith.mulf %335, %343 : vector<8x128xf32>
    %345 = arith.addf %342, %344 : vector<8x128xf32>
    %c2_i32 = arith.constant 2 : i32
    %346 = vector.broadcast %c2_i32 : i32 to vector<1x128xi32>
    %347 = arith.cmpi sle, %11, %346 : vector<1x128xi32>
    %348 = vector.shape_cast %347 : vector<1x128xi1> to vector<1x128xi1>
    %349 = vector.broadcast %348 : vector<1x128xi1> to vector<8x128xi1>
    %350 = arith.select %349, %345, %299 : vector<8x128xi1>, vector<8x128xf32>
    %c1_i32_65 = arith.constant 1 : i32
    %351 = tpu.dynamic_rotate %350 by %c1_i32_65 dim 1 : vector<8x128xf32>, i32 -> vector<8x128xf32>
    %352 = vector.broadcast %1 : vector<1x128xf32> to vector<8x128xf32>
    %353 = arith.mulf %351, %352 : vector<8x128xf32>
    %354 = arith.addf %353, %98 : vector<8x128xf32>
    %355 = vector.broadcast %4 : vector<1x128xf32> to vector<8x128xf32>
    %356 = arith.addf %354, %355 : vector<8x128xf32>
    %357 = vector.broadcast %2 : vector<1x128xf32> to vector<8x128xf32>
    %358 = arith.mulf %351, %357 : vector<8x128xf32>
    %359 = arith.addf %358, %105 : vector<8x128xf32>
    %360 = vector.broadcast %5 : vector<1x128xf32> to vector<8x128xf32>
    %361 = arith.addf %359, %360 : vector<8x128xf32>
    %362 = vector.broadcast %3 : vector<1x128xf32> to vector<8x128xf32>
    %363 = arith.mulf %351, %362 : vector<8x128xf32>
    %364 = arith.addf %363, %112 : vector<8x128xf32>
    %365 = vector.broadcast %6 : vector<1x128xf32> to vector<8x128xf32>
    %366 = arith.addf %364, %365 : vector<8x128xf32>
    %367 = vector.broadcast %7 : vector<1x128xf32> to vector<8x128xf32>
    %368 = arith.mulf %350, %367 : vector<8x128xf32>
    %369 = arith.addf %356, %368 : vector<8x128xf32>
    %cst_66 = arith.constant 5.000000e-01 : f32
    %370 = vector.broadcast %cst_66 : f32 to vector<8x128xf32>
    %371 = arith.mulf %370, %369 : vector<8x128xf32>
    %372 = math.tanh %371 : vector<8x128xf32>
    %cst_67 = arith.constant 5.000000e-01 : f32
    %373 = vector.broadcast %cst_67 : f32 to vector<8x128xf32>
    %374 = arith.mulf %373, %372 : vector<8x128xf32>
    %cst_68 = arith.constant 5.000000e-01 : f32
    %375 = vector.broadcast %cst_68 : f32 to vector<8x128xf32>
    %376 = arith.addf %374, %375 : vector<8x128xf32>
    %377 = vector.broadcast %8 : vector<1x128xf32> to vector<8x128xf32>
    %378 = arith.mulf %350, %377 : vector<8x128xf32>
    %379 = arith.addf %361, %378 : vector<8x128xf32>
    %cst_69 = arith.constant 5.000000e-01 : f32
    %380 = vector.broadcast %cst_69 : f32 to vector<8x128xf32>
    %381 = arith.mulf %380, %379 : vector<8x128xf32>
    %382 = math.tanh %381 : vector<8x128xf32>
    %cst_70 = arith.constant 5.000000e-01 : f32
    %383 = vector.broadcast %cst_70 : f32 to vector<8x128xf32>
    %384 = arith.mulf %383, %382 : vector<8x128xf32>
    %cst_71 = arith.constant 5.000000e-01 : f32
    %385 = vector.broadcast %cst_71 : f32 to vector<8x128xf32>
    %386 = arith.addf %384, %385 : vector<8x128xf32>
    %387 = vector.broadcast %9 : vector<1x128xf32> to vector<8x128xf32>
    %388 = arith.mulf %350, %387 : vector<8x128xf32>
    %389 = vector.broadcast %10 : vector<1x128xf32> to vector<8x128xf32>
    %390 = arith.addf %388, %389 : vector<8x128xf32>
    %391 = arith.mulf %376, %390 : vector<8x128xf32>
    %392 = arith.addf %366, %391 : vector<8x128xf32>
    %393 = math.tanh %392 : vector<8x128xf32>
    %394 = arith.subf %350, %393 : vector<8x128xf32>
    %395 = arith.mulf %386, %394 : vector<8x128xf32>
    %396 = arith.addf %393, %395 : vector<8x128xf32>
    %c3_i32 = arith.constant 3 : i32
    %397 = vector.broadcast %c3_i32 : i32 to vector<1x128xi32>
    %398 = arith.cmpi sle, %11, %397 : vector<1x128xi32>
    %399 = vector.shape_cast %398 : vector<1x128xi1> to vector<1x128xi1>
    %400 = vector.broadcast %399 : vector<1x128xi1> to vector<8x128xi1>
    %401 = arith.select %400, %396, %350 : vector<8x128xi1>, vector<8x128xf32>
    %c1_i32_72 = arith.constant 1 : i32
    %402 = tpu.dynamic_rotate %401 by %c1_i32_72 dim 1 : vector<8x128xf32>, i32 -> vector<8x128xf32>
    %403 = vector.broadcast %1 : vector<1x128xf32> to vector<8x128xf32>
    %404 = arith.mulf %402, %403 : vector<8x128xf32>
    %405 = arith.addf %404, %119 : vector<8x128xf32>
    %406 = vector.broadcast %4 : vector<1x128xf32> to vector<8x128xf32>
    %407 = arith.addf %405, %406 : vector<8x128xf32>
    %408 = vector.broadcast %2 : vector<1x128xf32> to vector<8x128xf32>
    %409 = arith.mulf %402, %408 : vector<8x128xf32>
    %410 = arith.addf %409, %126 : vector<8x128xf32>
    %411 = vector.broadcast %5 : vector<1x128xf32> to vector<8x128xf32>
    %412 = arith.addf %410, %411 : vector<8x128xf32>
    %413 = vector.broadcast %3 : vector<1x128xf32> to vector<8x128xf32>
    %414 = arith.mulf %402, %413 : vector<8x128xf32>
    %415 = arith.addf %414, %133 : vector<8x128xf32>
    %416 = vector.broadcast %6 : vector<1x128xf32> to vector<8x128xf32>
    %417 = arith.addf %415, %416 : vector<8x128xf32>
    %418 = vector.broadcast %7 : vector<1x128xf32> to vector<8x128xf32>
    %419 = arith.mulf %401, %418 : vector<8x128xf32>
    %420 = arith.addf %407, %419 : vector<8x128xf32>
    %cst_73 = arith.constant 5.000000e-01 : f32
    %421 = vector.broadcast %cst_73 : f32 to vector<8x128xf32>
    %422 = arith.mulf %421, %420 : vector<8x128xf32>
    %423 = math.tanh %422 : vector<8x128xf32>
    %cst_74 = arith.constant 5.000000e-01 : f32
    %424 = vector.broadcast %cst_74 : f32 to vector<8x128xf32>
    %425 = arith.mulf %424, %423 : vector<8x128xf32>
    %cst_75 = arith.constant 5.000000e-01 : f32
    %426 = vector.broadcast %cst_75 : f32 to vector<8x128xf32>
    %427 = arith.addf %425, %426 : vector<8x128xf32>
    %428 = vector.broadcast %8 : vector<1x128xf32> to vector<8x128xf32>
    %429 = arith.mulf %401, %428 : vector<8x128xf32>
    %430 = arith.addf %412, %429 : vector<8x128xf32>
    %cst_76 = arith.constant 5.000000e-01 : f32
    %431 = vector.broadcast %cst_76 : f32 to vector<8x128xf32>
    %432 = arith.mulf %431, %430 : vector<8x128xf32>
    %433 = math.tanh %432 : vector<8x128xf32>
    %cst_77 = arith.constant 5.000000e-01 : f32
    %434 = vector.broadcast %cst_77 : f32 to vector<8x128xf32>
    %435 = arith.mulf %434, %433 : vector<8x128xf32>
    %cst_78 = arith.constant 5.000000e-01 : f32
    %436 = vector.broadcast %cst_78 : f32 to vector<8x128xf32>
    %437 = arith.addf %435, %436 : vector<8x128xf32>
    %438 = vector.broadcast %9 : vector<1x128xf32> to vector<8x128xf32>
    %439 = arith.mulf %401, %438 : vector<8x128xf32>
    %440 = vector.broadcast %10 : vector<1x128xf32> to vector<8x128xf32>
    %441 = arith.addf %439, %440 : vector<8x128xf32>
    %442 = arith.mulf %427, %441 : vector<8x128xf32>
    %443 = arith.addf %417, %442 : vector<8x128xf32>
    %444 = math.tanh %443 : vector<8x128xf32>
    %445 = arith.subf %401, %444 : vector<8x128xf32>
    %446 = arith.mulf %437, %445 : vector<8x128xf32>
    %447 = arith.addf %444, %446 : vector<8x128xf32>
    %c4_i32 = arith.constant 4 : i32
    %448 = vector.broadcast %c4_i32 : i32 to vector<1x128xi32>
    %449 = arith.cmpi sle, %11, %448 : vector<1x128xi32>
    %450 = vector.shape_cast %449 : vector<1x128xi1> to vector<1x128xi1>
    %451 = vector.broadcast %450 : vector<1x128xi1> to vector<8x128xi1>
    %452 = arith.select %451, %447, %401 : vector<8x128xi1>, vector<8x128xf32>
    %c1_i32_79 = arith.constant 1 : i32
    %453 = tpu.dynamic_rotate %452 by %c1_i32_79 dim 1 : vector<8x128xf32>, i32 -> vector<8x128xf32>
    %454 = vector.broadcast %1 : vector<1x128xf32> to vector<8x128xf32>
    %455 = arith.mulf %453, %454 : vector<8x128xf32>
    %456 = arith.addf %455, %140 : vector<8x128xf32>
    %457 = vector.broadcast %4 : vector<1x128xf32> to vector<8x128xf32>
    %458 = arith.addf %456, %457 : vector<8x128xf32>
    %459 = vector.broadcast %2 : vector<1x128xf32> to vector<8x128xf32>
    %460 = arith.mulf %453, %459 : vector<8x128xf32>
    %461 = arith.addf %460, %147 : vector<8x128xf32>
    %462 = vector.broadcast %5 : vector<1x128xf32> to vector<8x128xf32>
    %463 = arith.addf %461, %462 : vector<8x128xf32>
    %464 = vector.broadcast %3 : vector<1x128xf32> to vector<8x128xf32>
    %465 = arith.mulf %453, %464 : vector<8x128xf32>
    %466 = arith.addf %465, %154 : vector<8x128xf32>
    %467 = vector.broadcast %6 : vector<1x128xf32> to vector<8x128xf32>
    %468 = arith.addf %466, %467 : vector<8x128xf32>
    %469 = vector.broadcast %7 : vector<1x128xf32> to vector<8x128xf32>
    %470 = arith.mulf %452, %469 : vector<8x128xf32>
    %471 = arith.addf %458, %470 : vector<8x128xf32>
    %cst_80 = arith.constant 5.000000e-01 : f32
    %472 = vector.broadcast %cst_80 : f32 to vector<8x128xf32>
    %473 = arith.mulf %472, %471 : vector<8x128xf32>
    %474 = math.tanh %473 : vector<8x128xf32>
    %cst_81 = arith.constant 5.000000e-01 : f32
    %475 = vector.broadcast %cst_81 : f32 to vector<8x128xf32>
    %476 = arith.mulf %475, %474 : vector<8x128xf32>
    %cst_82 = arith.constant 5.000000e-01 : f32
    %477 = vector.broadcast %cst_82 : f32 to vector<8x128xf32>
    %478 = arith.addf %476, %477 : vector<8x128xf32>
    %479 = vector.broadcast %8 : vector<1x128xf32> to vector<8x128xf32>
    %480 = arith.mulf %452, %479 : vector<8x128xf32>
    %481 = arith.addf %463, %480 : vector<8x128xf32>
    %cst_83 = arith.constant 5.000000e-01 : f32
    %482 = vector.broadcast %cst_83 : f32 to vector<8x128xf32>
    %483 = arith.mulf %482, %481 : vector<8x128xf32>
    %484 = math.tanh %483 : vector<8x128xf32>
    %cst_84 = arith.constant 5.000000e-01 : f32
    %485 = vector.broadcast %cst_84 : f32 to vector<8x128xf32>
    %486 = arith.mulf %485, %484 : vector<8x128xf32>
    %cst_85 = arith.constant 5.000000e-01 : f32
    %487 = vector.broadcast %cst_85 : f32 to vector<8x128xf32>
    %488 = arith.addf %486, %487 : vector<8x128xf32>
    %489 = vector.broadcast %9 : vector<1x128xf32> to vector<8x128xf32>
    %490 = arith.mulf %452, %489 : vector<8x128xf32>
    %491 = vector.broadcast %10 : vector<1x128xf32> to vector<8x128xf32>
    %492 = arith.addf %490, %491 : vector<8x128xf32>
    %493 = arith.mulf %478, %492 : vector<8x128xf32>
    %494 = arith.addf %468, %493 : vector<8x128xf32>
    %495 = math.tanh %494 : vector<8x128xf32>
    %496 = arith.subf %452, %495 : vector<8x128xf32>
    %497 = arith.mulf %488, %496 : vector<8x128xf32>
    %498 = arith.addf %495, %497 : vector<8x128xf32>
    %c1_i32_86 = arith.constant 1 : i32
    %499 = tpu.dynamic_rotate %498 by %c1_i32_86 dim 1 : vector<8x128xf32>, i32 -> vector<8x128xf32>
    %500 = vector.broadcast %1 : vector<1x128xf32> to vector<8x128xf32>
    %501 = arith.mulf %499, %500 : vector<8x128xf32>
    %502 = arith.addf %501, %161 : vector<8x128xf32>
    %503 = vector.broadcast %4 : vector<1x128xf32> to vector<8x128xf32>
    %504 = arith.addf %502, %503 : vector<8x128xf32>
    %505 = vector.broadcast %2 : vector<1x128xf32> to vector<8x128xf32>
    %506 = arith.mulf %499, %505 : vector<8x128xf32>
    %507 = arith.addf %506, %168 : vector<8x128xf32>
    %508 = vector.broadcast %5 : vector<1x128xf32> to vector<8x128xf32>
    %509 = arith.addf %507, %508 : vector<8x128xf32>
    %510 = vector.broadcast %3 : vector<1x128xf32> to vector<8x128xf32>
    %511 = arith.mulf %499, %510 : vector<8x128xf32>
    %512 = arith.addf %511, %175 : vector<8x128xf32>
    %513 = vector.broadcast %6 : vector<1x128xf32> to vector<8x128xf32>
    %514 = arith.addf %512, %513 : vector<8x128xf32>
    %515 = vector.broadcast %7 : vector<1x128xf32> to vector<8x128xf32>
    %516 = arith.mulf %498, %515 : vector<8x128xf32>
    %517 = arith.addf %504, %516 : vector<8x128xf32>
    %cst_87 = arith.constant 5.000000e-01 : f32
    %518 = vector.broadcast %cst_87 : f32 to vector<8x128xf32>
    %519 = arith.mulf %518, %517 : vector<8x128xf32>
    %520 = math.tanh %519 : vector<8x128xf32>
    %cst_88 = arith.constant 5.000000e-01 : f32
    %521 = vector.broadcast %cst_88 : f32 to vector<8x128xf32>
    %522 = arith.mulf %521, %520 : vector<8x128xf32>
    %cst_89 = arith.constant 5.000000e-01 : f32
    %523 = vector.broadcast %cst_89 : f32 to vector<8x128xf32>
    %524 = arith.addf %522, %523 : vector<8x128xf32>
    %525 = vector.broadcast %8 : vector<1x128xf32> to vector<8x128xf32>
    %526 = arith.mulf %498, %525 : vector<8x128xf32>
    %527 = arith.addf %509, %526 : vector<8x128xf32>
    %cst_90 = arith.constant 5.000000e-01 : f32
    %528 = vector.broadcast %cst_90 : f32 to vector<8x128xf32>
    %529 = arith.mulf %528, %527 : vector<8x128xf32>
    %530 = math.tanh %529 : vector<8x128xf32>
    %cst_91 = arith.constant 5.000000e-01 : f32
    %531 = vector.broadcast %cst_91 : f32 to vector<8x128xf32>
    %532 = arith.mulf %531, %530 : vector<8x128xf32>
    %cst_92 = arith.constant 5.000000e-01 : f32
    %533 = vector.broadcast %cst_92 : f32 to vector<8x128xf32>
    %534 = arith.addf %532, %533 : vector<8x128xf32>
    %535 = vector.broadcast %9 : vector<1x128xf32> to vector<8x128xf32>
    %536 = arith.mulf %498, %535 : vector<8x128xf32>
    %537 = vector.broadcast %10 : vector<1x128xf32> to vector<8x128xf32>
    %538 = arith.addf %536, %537 : vector<8x128xf32>
    %539 = arith.mulf %524, %538 : vector<8x128xf32>
    %540 = arith.addf %514, %539 : vector<8x128xf32>
    %541 = math.tanh %540 : vector<8x128xf32>
    %542 = arith.subf %498, %541 : vector<8x128xf32>
    %543 = arith.mulf %534, %542 : vector<8x128xf32>
    %544 = arith.addf %541, %543 : vector<8x128xf32>
    %c1_i32_93 = arith.constant 1 : i32
    %545 = tpu.dynamic_rotate %544 by %c1_i32_93 dim 1 : vector<8x128xf32>, i32 -> vector<8x128xf32>
    %546 = vector.broadcast %1 : vector<1x128xf32> to vector<8x128xf32>
    %547 = arith.mulf %545, %546 : vector<8x128xf32>
    %548 = arith.addf %547, %182 : vector<8x128xf32>
    %549 = vector.broadcast %4 : vector<1x128xf32> to vector<8x128xf32>
    %550 = arith.addf %548, %549 : vector<8x128xf32>
    %551 = vector.broadcast %2 : vector<1x128xf32> to vector<8x128xf32>
    %552 = arith.mulf %545, %551 : vector<8x128xf32>
    %553 = arith.addf %552, %189 : vector<8x128xf32>
    %554 = vector.broadcast %5 : vector<1x128xf32> to vector<8x128xf32>
    %555 = arith.addf %553, %554 : vector<8x128xf32>
    %556 = vector.broadcast %3 : vector<1x128xf32> to vector<8x128xf32>
    %557 = arith.mulf %545, %556 : vector<8x128xf32>
    %558 = arith.addf %557, %196 : vector<8x128xf32>
    %559 = vector.broadcast %6 : vector<1x128xf32> to vector<8x128xf32>
    %560 = arith.addf %558, %559 : vector<8x128xf32>
    %561 = vector.broadcast %7 : vector<1x128xf32> to vector<8x128xf32>
    %562 = arith.mulf %544, %561 : vector<8x128xf32>
    %563 = arith.addf %550, %562 : vector<8x128xf32>
    %cst_94 = arith.constant 5.000000e-01 : f32
    %564 = vector.broadcast %cst_94 : f32 to vector<8x128xf32>
    %565 = arith.mulf %564, %563 : vector<8x128xf32>
    %566 = math.tanh %565 : vector<8x128xf32>
    %cst_95 = arith.constant 5.000000e-01 : f32
    %567 = vector.broadcast %cst_95 : f32 to vector<8x128xf32>
    %568 = arith.mulf %567, %566 : vector<8x128xf32>
    %cst_96 = arith.constant 5.000000e-01 : f32
    %569 = vector.broadcast %cst_96 : f32 to vector<8x128xf32>
    %570 = arith.addf %568, %569 : vector<8x128xf32>
    %571 = vector.broadcast %8 : vector<1x128xf32> to vector<8x128xf32>
    %572 = arith.mulf %544, %571 : vector<8x128xf32>
    %573 = arith.addf %555, %572 : vector<8x128xf32>
    %cst_97 = arith.constant 5.000000e-01 : f32
    %574 = vector.broadcast %cst_97 : f32 to vector<8x128xf32>
    %575 = arith.mulf %574, %573 : vector<8x128xf32>
    %576 = math.tanh %575 : vector<8x128xf32>
    %cst_98 = arith.constant 5.000000e-01 : f32
    %577 = vector.broadcast %cst_98 : f32 to vector<8x128xf32>
    %578 = arith.mulf %577, %576 : vector<8x128xf32>
    %cst_99 = arith.constant 5.000000e-01 : f32
    %579 = vector.broadcast %cst_99 : f32 to vector<8x128xf32>
    %580 = arith.addf %578, %579 : vector<8x128xf32>
    %581 = vector.broadcast %9 : vector<1x128xf32> to vector<8x128xf32>
    %582 = arith.mulf %544, %581 : vector<8x128xf32>
    %583 = vector.broadcast %10 : vector<1x128xf32> to vector<8x128xf32>
    %584 = arith.addf %582, %583 : vector<8x128xf32>
    %585 = arith.mulf %570, %584 : vector<8x128xf32>
    %586 = arith.addf %560, %585 : vector<8x128xf32>
    %587 = math.tanh %586 : vector<8x128xf32>
    %588 = arith.subf %544, %587 : vector<8x128xf32>
    %589 = arith.mulf %580, %588 : vector<8x128xf32>
    %590 = arith.addf %587, %589 : vector<8x128xf32>
    %c1_i32_100 = arith.constant 1 : i32
    %591 = tpu.dynamic_rotate %590 by %c1_i32_100 dim 1 : vector<8x128xf32>, i32 -> vector<8x128xf32>
    %592 = vector.broadcast %1 : vector<1x128xf32> to vector<8x128xf32>
    %593 = arith.mulf %591, %592 : vector<8x128xf32>
    %594 = arith.addf %593, %182 : vector<8x128xf32>
    %595 = vector.broadcast %4 : vector<1x128xf32> to vector<8x128xf32>
    %596 = arith.addf %594, %595 : vector<8x128xf32>
    %597 = vector.broadcast %2 : vector<1x128xf32> to vector<8x128xf32>
    %598 = arith.mulf %591, %597 : vector<8x128xf32>
    %599 = arith.addf %598, %189 : vector<8x128xf32>
    %600 = vector.broadcast %5 : vector<1x128xf32> to vector<8x128xf32>
    %601 = arith.addf %599, %600 : vector<8x128xf32>
    %602 = vector.broadcast %3 : vector<1x128xf32> to vector<8x128xf32>
    %603 = arith.mulf %591, %602 : vector<8x128xf32>
    %604 = arith.addf %603, %196 : vector<8x128xf32>
    %605 = vector.broadcast %6 : vector<1x128xf32> to vector<8x128xf32>
    %606 = arith.addf %604, %605 : vector<8x128xf32>
    %607 = vector.broadcast %7 : vector<1x128xf32> to vector<8x128xf32>
    %608 = arith.mulf %590, %607 : vector<8x128xf32>
    %609 = arith.addf %596, %608 : vector<8x128xf32>
    %cst_101 = arith.constant 5.000000e-01 : f32
    %610 = vector.broadcast %cst_101 : f32 to vector<8x128xf32>
    %611 = arith.mulf %610, %609 : vector<8x128xf32>
    %612 = math.tanh %611 : vector<8x128xf32>
    %cst_102 = arith.constant 5.000000e-01 : f32
    %613 = vector.broadcast %cst_102 : f32 to vector<8x128xf32>
    %614 = arith.mulf %613, %612 : vector<8x128xf32>
    %cst_103 = arith.constant 5.000000e-01 : f32
    %615 = vector.broadcast %cst_103 : f32 to vector<8x128xf32>
    %616 = arith.addf %614, %615 : vector<8x128xf32>
    %617 = vector.broadcast %8 : vector<1x128xf32> to vector<8x128xf32>
    %618 = arith.mulf %590, %617 : vector<8x128xf32>
    %619 = arith.addf %601, %618 : vector<8x128xf32>
    %cst_104 = arith.constant 5.000000e-01 : f32
    %620 = vector.broadcast %cst_104 : f32 to vector<8x128xf32>
    %621 = arith.mulf %620, %619 : vector<8x128xf32>
    %622 = math.tanh %621 : vector<8x128xf32>
    %cst_105 = arith.constant 5.000000e-01 : f32
    %623 = vector.broadcast %cst_105 : f32 to vector<8x128xf32>
    %624 = arith.mulf %623, %622 : vector<8x128xf32>
    %cst_106 = arith.constant 5.000000e-01 : f32
    %625 = vector.broadcast %cst_106 : f32 to vector<8x128xf32>
    %626 = arith.addf %624, %625 : vector<8x128xf32>
    %627 = vector.broadcast %9 : vector<1x128xf32> to vector<8x128xf32>
    %628 = arith.mulf %590, %627 : vector<8x128xf32>
    %629 = vector.broadcast %10 : vector<1x128xf32> to vector<8x128xf32>
    %630 = arith.addf %628, %629 : vector<8x128xf32>
    %631 = arith.mulf %616, %630 : vector<8x128xf32>
    %632 = arith.addf %606, %631 : vector<8x128xf32>
    %633 = math.tanh %632 : vector<8x128xf32>
    %634 = arith.subf %590, %633 : vector<8x128xf32>
    %635 = arith.mulf %626, %634 : vector<8x128xf32>
    %636 = arith.addf %633, %635 : vector<8x128xf32>
    %c1_i32_107 = arith.constant 1 : i32
    %637 = tpu.dynamic_rotate %636 by %c1_i32_107 dim 1 : vector<8x128xf32>, i32 -> vector<8x128xf32>
    %638 = vector.broadcast %1 : vector<1x128xf32> to vector<8x128xf32>
    %639 = arith.mulf %637, %638 : vector<8x128xf32>
    %640 = arith.addf %639, %182 : vector<8x128xf32>
    %641 = vector.broadcast %4 : vector<1x128xf32> to vector<8x128xf32>
    %642 = arith.addf %640, %641 : vector<8x128xf32>
    %643 = vector.broadcast %2 : vector<1x128xf32> to vector<8x128xf32>
    %644 = arith.mulf %637, %643 : vector<8x128xf32>
    %645 = arith.addf %644, %189 : vector<8x128xf32>
    %646 = vector.broadcast %5 : vector<1x128xf32> to vector<8x128xf32>
    %647 = arith.addf %645, %646 : vector<8x128xf32>
    %648 = vector.broadcast %3 : vector<1x128xf32> to vector<8x128xf32>
    %649 = arith.mulf %637, %648 : vector<8x128xf32>
    %650 = arith.addf %649, %196 : vector<8x128xf32>
    %651 = vector.broadcast %6 : vector<1x128xf32> to vector<8x128xf32>
    %652 = arith.addf %650, %651 : vector<8x128xf32>
    %653 = vector.broadcast %7 : vector<1x128xf32> to vector<8x128xf32>
    %654 = arith.mulf %636, %653 : vector<8x128xf32>
    %655 = arith.addf %642, %654 : vector<8x128xf32>
    %cst_108 = arith.constant 5.000000e-01 : f32
    %656 = vector.broadcast %cst_108 : f32 to vector<8x128xf32>
    %657 = arith.mulf %656, %655 : vector<8x128xf32>
    %658 = math.tanh %657 : vector<8x128xf32>
    %cst_109 = arith.constant 5.000000e-01 : f32
    %659 = vector.broadcast %cst_109 : f32 to vector<8x128xf32>
    %660 = arith.mulf %659, %658 : vector<8x128xf32>
    %cst_110 = arith.constant 5.000000e-01 : f32
    %661 = vector.broadcast %cst_110 : f32 to vector<8x128xf32>
    %662 = arith.addf %660, %661 : vector<8x128xf32>
    %663 = vector.broadcast %8 : vector<1x128xf32> to vector<8x128xf32>
    %664 = arith.mulf %636, %663 : vector<8x128xf32>
    %665 = arith.addf %647, %664 : vector<8x128xf32>
    %cst_111 = arith.constant 5.000000e-01 : f32
    %666 = vector.broadcast %cst_111 : f32 to vector<8x128xf32>
    %667 = arith.mulf %666, %665 : vector<8x128xf32>
    %668 = math.tanh %667 : vector<8x128xf32>
    %cst_112 = arith.constant 5.000000e-01 : f32
    %669 = vector.broadcast %cst_112 : f32 to vector<8x128xf32>
    %670 = arith.mulf %669, %668 : vector<8x128xf32>
    %cst_113 = arith.constant 5.000000e-01 : f32
    %671 = vector.broadcast %cst_113 : f32 to vector<8x128xf32>
    %672 = arith.addf %670, %671 : vector<8x128xf32>
    %673 = vector.broadcast %9 : vector<1x128xf32> to vector<8x128xf32>
    %674 = arith.mulf %636, %673 : vector<8x128xf32>
    %675 = vector.broadcast %10 : vector<1x128xf32> to vector<8x128xf32>
    %676 = arith.addf %674, %675 : vector<8x128xf32>
    %677 = arith.mulf %662, %676 : vector<8x128xf32>
    %678 = arith.addf %652, %677 : vector<8x128xf32>
    %679 = math.tanh %678 : vector<8x128xf32>
    %680 = arith.subf %636, %679 : vector<8x128xf32>
    %681 = arith.mulf %672, %680 : vector<8x128xf32>
    %682 = arith.addf %679, %681 : vector<8x128xf32>
    %c1_i32_114 = arith.constant 1 : i32
    %683 = tpu.dynamic_rotate %682 by %c1_i32_114 dim 1 : vector<8x128xf32>, i32 -> vector<8x128xf32>
    %684 = vector.broadcast %1 : vector<1x128xf32> to vector<8x128xf32>
    %685 = arith.mulf %683, %684 : vector<8x128xf32>
    %686 = arith.addf %685, %182 : vector<8x128xf32>
    %687 = vector.broadcast %4 : vector<1x128xf32> to vector<8x128xf32>
    %688 = arith.addf %686, %687 : vector<8x128xf32>
    %689 = vector.broadcast %2 : vector<1x128xf32> to vector<8x128xf32>
    %690 = arith.mulf %683, %689 : vector<8x128xf32>
    %691 = arith.addf %690, %189 : vector<8x128xf32>
    %692 = vector.broadcast %5 : vector<1x128xf32> to vector<8x128xf32>
    %693 = arith.addf %691, %692 : vector<8x128xf32>
    %694 = vector.broadcast %3 : vector<1x128xf32> to vector<8x128xf32>
    %695 = arith.mulf %683, %694 : vector<8x128xf32>
    %696 = arith.addf %695, %196 : vector<8x128xf32>
    %697 = vector.broadcast %6 : vector<1x128xf32> to vector<8x128xf32>
    %698 = arith.addf %696, %697 : vector<8x128xf32>
    %699 = vector.broadcast %7 : vector<1x128xf32> to vector<8x128xf32>
    %700 = arith.mulf %682, %699 : vector<8x128xf32>
    %701 = arith.addf %688, %700 : vector<8x128xf32>
    %cst_115 = arith.constant 5.000000e-01 : f32
    %702 = vector.broadcast %cst_115 : f32 to vector<8x128xf32>
    %703 = arith.mulf %702, %701 : vector<8x128xf32>
    %704 = math.tanh %703 : vector<8x128xf32>
    %cst_116 = arith.constant 5.000000e-01 : f32
    %705 = vector.broadcast %cst_116 : f32 to vector<8x128xf32>
    %706 = arith.mulf %705, %704 : vector<8x128xf32>
    %cst_117 = arith.constant 5.000000e-01 : f32
    %707 = vector.broadcast %cst_117 : f32 to vector<8x128xf32>
    %708 = arith.addf %706, %707 : vector<8x128xf32>
    %709 = vector.broadcast %8 : vector<1x128xf32> to vector<8x128xf32>
    %710 = arith.mulf %682, %709 : vector<8x128xf32>
    %711 = arith.addf %693, %710 : vector<8x128xf32>
    %cst_118 = arith.constant 5.000000e-01 : f32
    %712 = vector.broadcast %cst_118 : f32 to vector<8x128xf32>
    %713 = arith.mulf %712, %711 : vector<8x128xf32>
    %714 = math.tanh %713 : vector<8x128xf32>
    %cst_119 = arith.constant 5.000000e-01 : f32
    %715 = vector.broadcast %cst_119 : f32 to vector<8x128xf32>
    %716 = arith.mulf %715, %714 : vector<8x128xf32>
    %cst_120 = arith.constant 5.000000e-01 : f32
    %717 = vector.broadcast %cst_120 : f32 to vector<8x128xf32>
    %718 = arith.addf %716, %717 : vector<8x128xf32>
    %719 = vector.broadcast %9 : vector<1x128xf32> to vector<8x128xf32>
    %720 = arith.mulf %682, %719 : vector<8x128xf32>
    %721 = vector.broadcast %10 : vector<1x128xf32> to vector<8x128xf32>
    %722 = arith.addf %720, %721 : vector<8x128xf32>
    %723 = arith.mulf %708, %722 : vector<8x128xf32>
    %724 = arith.addf %698, %723 : vector<8x128xf32>
    %725 = math.tanh %724 : vector<8x128xf32>
    %726 = arith.subf %682, %725 : vector<8x128xf32>
    %727 = arith.mulf %718, %726 : vector<8x128xf32>
    %728 = arith.addf %725, %727 : vector<8x128xf32>
    %c1_i32_121 = arith.constant 1 : i32
    %729 = tpu.dynamic_rotate %728 by %c1_i32_121 dim 1 : vector<8x128xf32>, i32 -> vector<8x128xf32>
    %730 = vector.broadcast %1 : vector<1x128xf32> to vector<8x128xf32>
    %731 = arith.mulf %729, %730 : vector<8x128xf32>
    %732 = arith.addf %731, %182 : vector<8x128xf32>
    %733 = vector.broadcast %4 : vector<1x128xf32> to vector<8x128xf32>
    %734 = arith.addf %732, %733 : vector<8x128xf32>
    %735 = vector.broadcast %2 : vector<1x128xf32> to vector<8x128xf32>
    %736 = arith.mulf %729, %735 : vector<8x128xf32>
    %737 = arith.addf %736, %189 : vector<8x128xf32>
    %738 = vector.broadcast %5 : vector<1x128xf32> to vector<8x128xf32>
    %739 = arith.addf %737, %738 : vector<8x128xf32>
    %740 = vector.broadcast %3 : vector<1x128xf32> to vector<8x128xf32>
    %741 = arith.mulf %729, %740 : vector<8x128xf32>
    %742 = arith.addf %741, %196 : vector<8x128xf32>
    %743 = vector.broadcast %6 : vector<1x128xf32> to vector<8x128xf32>
    %744 = arith.addf %742, %743 : vector<8x128xf32>
    %745 = vector.broadcast %7 : vector<1x128xf32> to vector<8x128xf32>
    %746 = arith.mulf %728, %745 : vector<8x128xf32>
    %747 = arith.addf %734, %746 : vector<8x128xf32>
    %cst_122 = arith.constant 5.000000e-01 : f32
    %748 = vector.broadcast %cst_122 : f32 to vector<8x128xf32>
    %749 = arith.mulf %748, %747 : vector<8x128xf32>
    %750 = math.tanh %749 : vector<8x128xf32>
    %cst_123 = arith.constant 5.000000e-01 : f32
    %751 = vector.broadcast %cst_123 : f32 to vector<8x128xf32>
    %752 = arith.mulf %751, %750 : vector<8x128xf32>
    %cst_124 = arith.constant 5.000000e-01 : f32
    %753 = vector.broadcast %cst_124 : f32 to vector<8x128xf32>
    %754 = arith.addf %752, %753 : vector<8x128xf32>
    %755 = vector.broadcast %8 : vector<1x128xf32> to vector<8x128xf32>
    %756 = arith.mulf %728, %755 : vector<8x128xf32>
    %757 = arith.addf %739, %756 : vector<8x128xf32>
    %cst_125 = arith.constant 5.000000e-01 : f32
    %758 = vector.broadcast %cst_125 : f32 to vector<8x128xf32>
    %759 = arith.mulf %758, %757 : vector<8x128xf32>
    %760 = math.tanh %759 : vector<8x128xf32>
    %cst_126 = arith.constant 5.000000e-01 : f32
    %761 = vector.broadcast %cst_126 : f32 to vector<8x128xf32>
    %762 = arith.mulf %761, %760 : vector<8x128xf32>
    %cst_127 = arith.constant 5.000000e-01 : f32
    %763 = vector.broadcast %cst_127 : f32 to vector<8x128xf32>
    %764 = arith.addf %762, %763 : vector<8x128xf32>
    %765 = vector.broadcast %9 : vector<1x128xf32> to vector<8x128xf32>
    %766 = arith.mulf %728, %765 : vector<8x128xf32>
    %767 = vector.broadcast %10 : vector<1x128xf32> to vector<8x128xf32>
    %768 = arith.addf %766, %767 : vector<8x128xf32>
    %769 = arith.mulf %754, %768 : vector<8x128xf32>
    %770 = arith.addf %744, %769 : vector<8x128xf32>
    %771 = math.tanh %770 : vector<8x128xf32>
    %772 = arith.subf %728, %771 : vector<8x128xf32>
    %773 = arith.mulf %764, %772 : vector<8x128xf32>
    %774 = arith.addf %771, %773 : vector<8x128xf32>
    %c1_i32_128 = arith.constant 1 : i32
    %775 = tpu.dynamic_rotate %774 by %c1_i32_128 dim 1 : vector<8x128xf32>, i32 -> vector<8x128xf32>
    %776 = vector.broadcast %1 : vector<1x128xf32> to vector<8x128xf32>
    %777 = arith.mulf %775, %776 : vector<8x128xf32>
    %778 = arith.addf %777, %182 : vector<8x128xf32>
    %779 = vector.broadcast %4 : vector<1x128xf32> to vector<8x128xf32>
    %780 = arith.addf %778, %779 : vector<8x128xf32>
    %781 = vector.broadcast %2 : vector<1x128xf32> to vector<8x128xf32>
    %782 = arith.mulf %775, %781 : vector<8x128xf32>
    %783 = arith.addf %782, %189 : vector<8x128xf32>
    %784 = vector.broadcast %5 : vector<1x128xf32> to vector<8x128xf32>
    %785 = arith.addf %783, %784 : vector<8x128xf32>
    %786 = vector.broadcast %3 : vector<1x128xf32> to vector<8x128xf32>
    %787 = arith.mulf %775, %786 : vector<8x128xf32>
    %788 = arith.addf %787, %196 : vector<8x128xf32>
    %789 = vector.broadcast %6 : vector<1x128xf32> to vector<8x128xf32>
    %790 = arith.addf %788, %789 : vector<8x128xf32>
    %791 = vector.broadcast %7 : vector<1x128xf32> to vector<8x128xf32>
    %792 = arith.mulf %774, %791 : vector<8x128xf32>
    %793 = arith.addf %780, %792 : vector<8x128xf32>
    %cst_129 = arith.constant 5.000000e-01 : f32
    %794 = vector.broadcast %cst_129 : f32 to vector<8x128xf32>
    %795 = arith.mulf %794, %793 : vector<8x128xf32>
    %796 = math.tanh %795 : vector<8x128xf32>
    %cst_130 = arith.constant 5.000000e-01 : f32
    %797 = vector.broadcast %cst_130 : f32 to vector<8x128xf32>
    %798 = arith.mulf %797, %796 : vector<8x128xf32>
    %cst_131 = arith.constant 5.000000e-01 : f32
    %799 = vector.broadcast %cst_131 : f32 to vector<8x128xf32>
    %800 = arith.addf %798, %799 : vector<8x128xf32>
    %801 = vector.broadcast %8 : vector<1x128xf32> to vector<8x128xf32>
    %802 = arith.mulf %774, %801 : vector<8x128xf32>
    %803 = arith.addf %785, %802 : vector<8x128xf32>
    %cst_132 = arith.constant 5.000000e-01 : f32
    %804 = vector.broadcast %cst_132 : f32 to vector<8x128xf32>
    %805 = arith.mulf %804, %803 : vector<8x128xf32>
    %806 = math.tanh %805 : vector<8x128xf32>
    %cst_133 = arith.constant 5.000000e-01 : f32
    %807 = vector.broadcast %cst_133 : f32 to vector<8x128xf32>
    %808 = arith.mulf %807, %806 : vector<8x128xf32>
    %cst_134 = arith.constant 5.000000e-01 : f32
    %809 = vector.broadcast %cst_134 : f32 to vector<8x128xf32>
    %810 = arith.addf %808, %809 : vector<8x128xf32>
    %811 = vector.broadcast %9 : vector<1x128xf32> to vector<8x128xf32>
    %812 = arith.mulf %774, %811 : vector<8x128xf32>
    %813 = vector.broadcast %10 : vector<1x128xf32> to vector<8x128xf32>
    %814 = arith.addf %812, %813 : vector<8x128xf32>
    %815 = arith.mulf %800, %814 : vector<8x128xf32>
    %816 = arith.addf %790, %815 : vector<8x128xf32>
    %817 = math.tanh %816 : vector<8x128xf32>
    %818 = arith.subf %774, %817 : vector<8x128xf32>
    %819 = arith.mulf %810, %818 : vector<8x128xf32>
    %820 = arith.addf %817, %819 : vector<8x128xf32>
    %c0_135 = arith.constant 0 : index
    %c0_136 = arith.constant 0 : index
    %821 = vector.load %arg2[%c0_135, %c0_136] : memref<8x128xf32, #tpu.memory_space<vmem>>, vector<8x128xf32>
    tpu.vector_store %arg2[%c0_135, %c0_136], %820 {strides = array<i32>} : memref<8x128xf32, #tpu.memory_space<vmem>>, vector<8x128xf32>,
    return
  }
}

</mosaic_0001>

<bundles_post_ra>
// kernel: model03_forward.1
= control target key start
LH: loop header
LB: loop body
LE: loop exit
PB: predicated region body
PF: predicated region fallthrough
CT: control target
= control target key end

     0   :  { %vm42_vm0 = vcmask 64512   ;;  %v1285_v35 = vmov 0.0   ;;  %s1286_s30 = smov 1   ;;  %vm153_vm1 = vcmask 1041409   ;;  %vm155_vm2 = vcmask 1042434   ;;  %s2221_s0 = inlined_call_operand.vmem [shape: f32[8,8,8], index: 0, kind: input, shape index: {}]   ;;  %s2222_s1 = inlined_call_operand.vmem [shape: f32[16,128], index: 1, kind: input, shape index: {}]   ;;  %s2223_s2 = inlined_call_operand.vmem [shape: f32[8,128], index: 2, kind: output, shape index: {}]  }
   0x1   :  { %v15_v0 = vld [vmem:[%s2221_s0 + $0x20] sm:$0xff]  ;;  %v1184_v1 = vld [vmem:[%s2222_s1 + $0xa] ss:$0 sm:$0xff]  ;;  %v1311_v2 = vld [vmem:[%s2221_s0 + $0x10] sm:$0xff]  ;;  %vm157_vm3 = vcmask 1043459   ;;  %vm159_vm4 = vcmask 1044484  }
   0x2   :  { %v11_v3 = vld [vmem:[%s2221_s0] sm:$0xff]  ;;  %v38_v4 = vmul.f32 %v1184_v1, %v15_v0  ;;  %v36_v5 = vmul.f32 %v1184_v1, %v1311_v2  ;;  %v16_v7 = vld [vmem:[%s2221_s0 + $0x28] sm:$0xff]  ;;  %v1323_v8 = vld [vmem:[%s2221_s0 + $0x18] sm:$0xff]  ;;  %vm161_vm5 = vcmask 1045509   ;;  %vm163_vm6 = vcmask 1046534  }
   0x3   :  { %v34_v6 = vmul.f32 %v1184_v1, %v11_v3  ;;  %v12_v12 = vld [vmem:[%s2221_s0 + $0x8] sm:$0xff]  ;;  %v39_v13 = vmul.f32 %v1184_v1, %v16_v7  ;;  %v37_v14 = vmul.f32 %v1184_v1, %v1323_v8  ;;  %v18_v19 = vld [vmem:[%s2221_s0 + $0x38] sm:$0xff]  ;;  %v17_v20 = vld [vmem:[%s2221_s0 + $0x30] sm:$0xff]  ;;  %vm165_vm7 = vcmask 1047559  }
   0x4   :  { %v55_v9 = vsel %vm42_vm0, %v38_v4, 0.0  ;;  %v49_v10 = vsel %vm42_vm0, %v36_v5, 0.0  ;;  %v35_v15 = vmul.f32 %v1184_v1, %v12_v12  ;;  %v41_v21 = vmul.f32 %v1184_v1, %v18_v19  ;;  %v1185_v24 = vld [vmem:[%s2222_s1 + $0xb] ss:$0 sm:$0xff]  ;;  %v1186_v34 = vld [vmem:[%s2222_s1 + $0xc] ss:$0 sm:$0xff] }
   0x5   :  { %v43_v11 = vsel %vm42_vm0, %v34_v6, 0.0  ;;  %56 = vadd.xlane.f32.xlu2 %v55_v9  ;;  %50 = vadd.xlane.f32.xlu1 %v49_v10  ;;  %v58_v16 = vsel %vm42_vm0, %v39_v13, 0.0  ;;  %v52_v17 = vsel %vm42_vm0, %v37_v14, 0.0  ;;  %v40_v22 = vmul.f32 %v1184_v1, %v17_v20 }
   0x6   :  { %44 = vadd.xlane.f32.xlu0 %v43_v11  ;;  %v46_v18 = vsel %vm42_vm0, %v35_v15, 0.0  ;;  %v64_v23 = vsel %vm42_vm0, %v41_v21, 0.0  ;;  %v70_v26 = vmul.f32 %v1185_v24, %v12_v12  ;;  %v69_v27 = vmul.f32 %v1185_v24, %v11_v3 }
   0x7   :  { %v61_v25 = vsel %vm42_vm0, %v40_v22, 0.0  ;;  %v72_v30 = vmul.f32 %v1185_v24, %v1323_v8  ;;  %v71_v31 = vmul.f32 %v1185_v24, %v1311_v2  ;;  %v74_v36 = vmul.f32 %v1185_v24, %v16_v7 }
   0x8   :  { %v80_v28 = vsel %vm42_vm0, %v70_v26, 0.0  ;;  %v77_v29 = vsel %vm42_vm0, %v69_v27, 0.0  ;;  %v107_v37 = vmul.f32 %v1186_v34, %v15_v0  ;;  %v108_v38 = vmul.f32 %v1186_v34, %v16_v7 }
   0x9   :  { %v86_v32 = vsel %vm42_vm0, %v72_v30, 0.0  ;;  %v83_v33 = vsel %vm42_vm0, %v71_v31, 0.0  ;;  %v73_v39 = vmul.f32 %v1185_v24, %v15_v0  ;;  %v92_v42 = vsel %vm42_vm0, %v74_v36, 0.0 }
   0xa   :  { %v123_v40 = vsel %vm42_vm0, %v107_v37, 0.0  ;;  %v126_v41 = vsel %vm42_vm0, %v108_v38, 0.0  ;;  %v103_v44 = vmul.f32 %v1186_v34, %v11_v3  ;;  %v75_v45 = vmul.f32 %v1185_v24, %v17_v20 }
   0xb   :  { %v89_v43 = vsel %vm42_vm0, %v73_v39, 0.0  ;;  %v110_v47 = vmul.f32 %v1186_v34, %v18_v19  ;;  %v104_v48 = vmul.f32 %v1186_v34, %v12_v12  ;;  %v76_v52 = vmul.f32 %v1185_v24, %v18_v19 }
   0xc   :  { %v111_v46 = vsel %vm42_vm0, %v103_v44, 0.0  ;;  %v95_v50 = vsel %vm42_vm0, %v75_v45, 0.0  ;;  %v105_v53 = vmul.f32 %v1186_v34, %v1311_v2  ;;  %v106_v56 = vmul.f32 %v1186_v34, %v1323_v8 }
   0xd   :  { %59 = vadd.xlane.f32.xlu2 %v58_v16  ;;  %53 = vadd.xlane.f32.xlu1 %v52_v17  ;;  %v132_v49 = vsel %vm42_vm0, %v110_v47, 0.0  ;;  %v114_v51 = vsel %vm42_vm0, %v104_v48, 0.0  ;;  %v98_v54 = vsel %vm42_vm0, %v76_v52, 0.0  ;;  %v109_v58 = vmul.f32 %v1186_v34, %v17_v20 }
   0xe   :  { %47 = vadd.xlane.f32.xlu0 %v46_v18  ;;  %v117_v55 = vsel %vm42_vm0, %v105_v53, 0.0  ;;  %v120_v57 = vsel %vm42_vm0, %v106_v56, 0.0  ;;  %v29_v13 = vlaneseq }
   0xf   :  { %v129_v59 = vsel %vm42_vm0, %v109_v58, 0.0 }
  0x10   :  { %v1432_v47 = vand.u32 127, %v29_v13 }
  0x12   :  { %vm31_vm8 = vcmp.eq.s32.totalorder %v1432_v47, 0  ;;  %vm785_vm9 = vcmp.le.s32.totalorder %v1432_v47, 0  ;;  %vm820_vm10 = vcmp.le.s32.totalorder %v1432_v47, 1  ;;  %vm855_vm11 = vcmp.le.s32.totalorder %v1432_v47, 2 }
  0x13   :  { %vm890_vm12 = vcmp.le.s32.totalorder %v1432_v47, 3  ;;  %vm925_vm13 = vcmp.le.s32.totalorder %v1432_v47, 4 }
  0x15   :  { %65 = vadd.xlane.f32.xlu1 %v64_v23 }
  0x16   :  { %62 = vadd.xlane.f32.xlu0 %v61_v25 }
  0x1d   :  { %81 = vadd.xlane.f32.xlu1 %v80_v28 }
  0x1e   :  { %78 = vadd.xlane.f32.xlu0 %v77_v29 }
  0x25   :  { %744 = vrot.lane.b32.xlu2 %v1285_v35, %s1286_s30  ;;  %87 = vadd.xlane.f32.xlu1 %v86_v32 }
  0x26   :  { %84 = vadd.xlane.f32.xlu0 %v83_v33 }
  0x2d   :  { %93 = vadd.xlane.f32.xlu1 %v92_v42 }
  0x2e   :  { %90 = vadd.xlane.f32.xlu0 %v89_v43 }
  0x35   :  { %96 = vadd.xlane.f32.xlu1 %v95_v50 }
  0x36   :  { %115 = vadd.xlane.f32.xlu0 %v114_v51 }
  0x3d   :  { %99 = vadd.xlane.f32.xlu1 %v98_v54 }
  0x3e   :  { %118 = vadd.xlane.f32.xlu0 %v117_v55 }
  0x45   :  { %124 = vadd.xlane.f32.xlu1 %v123_v40 }
  0x46   :  { %121 = vadd.xlane.f32.xlu0 %v120_v57 }
  0x4d   :  { %130 = vadd.xlane.f32.xlu1 %v129_v59 }
  0x4e   :  { %127 = vadd.xlane.f32.xlu0 %v126_v41  ;;  %112 = vadd.xlane.f32.xlu2 %v111_v46 }
  0x56   :  { %133 = vadd.xlane.f32.xlu0 %v132_v49 }
  0x78   :  { %v1370_v60 = vpop.xlane.xlu1 %50  ;;  %v1374_v62 = vpop.xlane.xlu2 %56 }
  0x79   :  { %v1372_v61 = vpop.xlane.xlu0 %44  ;;  %v221_v7 = vperm.slane %v1370_v60, 1  ;;  %v671_v11 = vperm.slane %v1370_v60, 7  ;;  %v139_v15 = vperm.slane %v1370_v60, 0  ;;  %v223_v27 = vperm.slane %v1374_v62, 1 }
  0x7a   :  { %v137_v3 = vperm.slane %v1372_v61, 0  ;;  %v219_v4 = vperm.slane %v1372_v61, 1  ;;  %v294_v8 = vperm.slane %v1372_v61, 2  ;;  %v669_v9 = vperm.slane %v1372_v61, 7 }
  0x7b   :  { %v296_v28 = vperm.slane %v1370_v60, 2  ;;  %v298_v30 = vperm.slane %v1374_v62, 2  ;;  %v141_v39 = vperm.slane %v1374_v62, 0  ;;  %v369_v43 = vperm.slane %v1372_v61, 3 }
  0x7c   :  { %v371_v46 = vperm.slane %v1370_v60, 3  ;;  %v444_v13 = vperm.slane %v1372_v61, 4 }
  0x80   :  { %v1376_v63 = vpop.xlane.xlu1 %53  ;;  %v1394_v16 = vpop.xlane.xlu2 %59 }
  0x81   :  { %v1378_v0 = vpop.xlane.xlu0 %47  ;;  %v222_v5 = vperm.slane %v1376_v63, 1  ;;  %v140_v20 = vperm.slane %v1376_v63, 0  ;;  %v297_v24 = vperm.slane %v1376_v63, 2  ;;  %v224_v29 = vperm.slane %v1394_v16, 1 }
  0x82   :  { %v138_v1 = vperm.slane %v1378_v0, 0  ;;  %v220_v2 = vperm.slane %v1378_v0, 1  ;;  %v295_v6 = vperm.slane %v1378_v0, 2  ;;  %v670_v10 = vperm.slane %v1378_v0, 7 }
  0x83   :  { %v370_v31 = vperm.slane %v1378_v0, 3  ;;  %v299_v41 = vperm.slane %v1394_v16, 2  ;;  %v142_v50 = vperm.slane %v1394_v16, 0  ;;  %v372_v55 = vperm.slane %v1376_v63, 3 }
  0x84   :  { %v154_v12 = vsel %vm153_vm1, %v138_v1, %v137_v3  ;;  %v235_v14 = vsel %vm153_vm1, %v220_v2, %v219_v4  ;;  %v685_v17 = vsel %vm153_vm1, %v670_v10, %v669_v9  ;;  %v310_v19 = vsel %vm153_vm1, %v295_v6, %v294_v8 }
  0x85   :  { %v236_v18 = vsel %vm155_vm2, %v221_v7, %v235_v14  ;;  %v1401_v21 = vsel %vm155_vm2, %v671_v11, %v685_v17  ;;  %v156_v25 = vsel %vm155_vm2, %v139_v15, %v154_v12  ;;  %v311_v38 = vsel %vm155_vm2, %v296_v28, %v310_v19  ;;  %v1464_v14 = vld [vmem:[%s2222_s1 + $0x6] ss:$0 sm:$0xff] }
  0x86   :  { %v237_v23 = vsel %vm157_vm3, %v222_v5, %v236_v18  ;;  %v158_v35 = vsel %vm157_vm3, %v140_v20, %v156_v25  ;;  %v312_v42 = vsel %vm157_vm3, %v297_v24, %v311_v38  ;;  %v385_v54 = vsel %vm153_vm1, %v370_v31, %v369_v43  ;;  %v1477_v24 = vld [vmem:[%s2222_s1] ss:$0 sm:$0xff] }
  0x87   :  { %v238_v34 = vsel %vm159_vm4, %v223_v27, %v237_v23  ;;  %v313_v45 = vsel %vm159_vm4, %v298_v30, %v312_v42  ;;  %v160_v48 = vsel %vm159_vm4, %v141_v39, %v158_v35  ;;  %v445_v56 = vperm.slane %v1378_v0, 4 }
  0x88   :  { %v1403_v22 = vpop.xlane.xlu1 %65  ;;  %v239_v36 = vsel %vm161_vm5, %v224_v29, %v238_v34  ;;  %v314_v49 = vsel %vm161_vm5, %v299_v41, %v313_v45  ;;  %v162_v2 = vsel %vm161_vm5, %v142_v50, %v160_v48  ;;  %v373_v20 = vperm.slane %v1374_v62, 3  ;;  %v1483_v29 = vpop.permute.xlu2 %744 }
  0x89   :  { %v1408_v26 = vpop.xlane.xlu0 %62  ;;  %v226_v33 = vperm.slane %v1403_v22, 1  ;;  %v301_v59 = vperm.slane %v1403_v22, 2  ;;  %v144_v1 = vperm.slane %v1403_v22, 0  ;;  %v386_v23 = vsel %vm155_vm2, %v371_v46, %v385_v54  ;;  %v1514_v54 = vld [vmem:[%s2222_s1 + $0x3] ss:$0 sm:$0xff] }
  0x8a   :  { %v225_v32 = vperm.slane %v1408_v26, 1  ;;  %v300_v37 = vperm.slane %v1408_v26, 2  ;;  %v143_v51 = vperm.slane %v1408_v26, 0  ;;  %v387_v27 = vsel %vm157_vm3, %v372_v55, %v386_v23 }
  0x8b   :  { %v388_v31 = vsel %vm159_vm4, %v373_v20, %v387_v27  ;;  %v446_v34 = vperm.slane %v1370_v60, 4  ;;  %v447_v38 = vperm.slane %v1376_v63, 4  ;;  %v747_v42 = vmul.f32 %v1477_v24, %v1483_v29 }
  0x8c   :  { %v240_v40 = vsel %vm163_vm6, %v225_v32, %v239_v36  ;;  %v315_v53 = vsel %vm163_vm6, %v300_v37, %v314_v49  ;;  %v164_v9 = vsel %vm163_vm6, %v143_v51, %v162_v2  ;;  %v460_v32 = vsel %vm153_vm1, %v445_v56, %v444_v13 }
  0x8d   :  { %v1428_v44 = vsel %vm165_vm7, %v226_v33, %v240_v40  ;;  %v1468_v17 = vsel %vm165_vm7, %v301_v59, %v315_v53  ;;  %v166_v25 = vsel %vm165_vm7, %v144_v1, %v164_v9  ;;  %v762_v36 = vmul.f32 0.0, %v1464_v14 }
  0x8e   :  { %2228 = vst [vmem:[#allocation2_spill] sm:$0xff] %v1468_v17  ;;  %v448_v37 = vperm.slane %v1374_v62, 4  ;;  %v168_v39 = vsel %vm31_vm8, %v166_v25, 0.0  ;;  %v374_v50 = vperm.slane %v1394_v16, 3  ;;  %v375_v51 = vperm.slane %v1408_v26, 3 }
  0x8f   :  { %v748_v53 = vadd.f32 %v747_v42, %v168_v39 }
  0x90   :  { %v1438_v52 = vpop.xlane.xlu1 %81 }
  0x91   :  { %v245_v57 = vperm.slane %v1438_v52, 1  ;;  %v1445_v58 = vpop.xlane.xlu0 %78  ;;  %v320_v3 = vperm.slane %v1438_v52, 2  ;;  %v695_v4 = vperm.slane %v1438_v52, 7  ;;  %v395_v5 = vperm.slane %v1438_v52, 3 }
  0x92   :  { %v244_v6 = vperm.slane %v1445_v58, 1  ;;  %v319_v7 = vperm.slane %v1445_v58, 2  ;;  %v394_v8 = vperm.slane %v1445_v58, 3  ;;  %v470_v10 = vperm.slane %v1438_v52, 4 }
  0x93   :  { %v469_v11 = vperm.slane %v1445_v58, 4  ;;  %v694_v12 = vperm.slane %v1445_v58, 7  ;;  %v169_v13 = vperm.slane %v1445_v58, 0 }
  0x94   :  { %v260_v15 = vsel %vm153_vm1, %v245_v57, %v244_v6  ;;  %v335_v19 = vsel %vm153_vm1, %v320_v3, %v319_v7  ;;  %v410_v28 = vsel %vm153_vm1, %v395_v5, %v394_v8  ;;  %v376_v57 = vperm.slane %v1403_v22, 3 }
  0x95   :  { %v710_v18 = vsel %vm153_vm1, %v695_v4, %v694_v12  ;;  %v1490_v33 = vsel %vm153_vm1, %v470_v10, %v469_v11  ;;  %v449_v3 = vperm.slane %v1394_v16, 4  ;;  %v389_v4 = vsel %vm161_vm5, %v374_v50, %v388_v31 }
  0x96   :  { %v450_v6 = vperm.slane %v1408_v26, 4  ;;  %v461_v7 = vsel %vm155_vm2, %v446_v34, %v460_v32  ;;  %v170_v8 = vperm.slane %v1438_v52, 0  ;;  %v390_v10 = vsel %vm163_vm6, %v375_v51, %v389_v4 }
  0x97   :  { %v462_v12 = vsel %vm157_vm3, %v447_v38, %v461_v7  ;;  %v1546_v31 = vsel %vm165_vm7, %v376_v57, %v390_v10  ;;  %v521_v50 = vperm.slane %v1370_v60, 5 }
  0x98   :  { %v1485_v30 = vpop.xlane.xlu1 %87  ;;  %2229 = vst [vmem:[#allocation3_spill] sm:$0xff] %v1546_v31  ;;  %v463_v38 = vsel %vm159_vm4, %v448_v37, %v462_v12  ;;  %v545_v12 = vperm.slane %v1438_v52, 5 }
  0x99   :  { %v1493_v35 = vpop.xlane.xlu0 %84  ;;  %v247_v40 = vperm.slane %v1485_v30, 1  ;;  %v322_v41 = vperm.slane %v1485_v30, 2  ;;  %v397_v48 = vperm.slane %v1485_v30, 3  ;;  %v472_v39 = vperm.slane %v1485_v30, 4 }
  0x9a   :  { %v246_v43 = vperm.slane %v1493_v35, 1  ;;  %v321_v45 = vperm.slane %v1493_v35, 2  ;;  %v396_v46 = vperm.slane %v1493_v35, 3  ;;  %v696_v49 = vperm.slane %v1493_v35, 7 }
  0x9b   :  { %v471_v23 = vperm.slane %v1493_v35, 4  ;;  %v464_v51 = vsel %vm161_vm5, %v449_v3, %v463_v38 }
  0x9c   :  { %v261_v55 = vsel %vm155_vm2, %v246_v43, %v260_v15  ;;  %v336_v56 = vsel %vm155_vm2, %v321_v45, %v335_v19  ;;  %v1520_v59 = vsel %vm155_vm2, %v696_v49, %v710_v18  ;;  %v411_v5 = vsel %vm155_vm2, %v396_v46, %v410_v28 }
  0x9d   :  { %v262_v1 = vsel %vm157_vm3, %v247_v40, %v261_v55  ;;  %v337_v2 = vsel %vm157_vm3, %v322_v41, %v336_v56  ;;  %v412_v11 = vsel %vm157_vm3, %v397_v48, %v411_v5  ;;  %v750_v18 = vadd.f32 %v1514_v54, %v748_v53 }
  0x9e   :  { %v451_v28 = vperm.slane %v1403_v22, 4  ;;  %v171_v40 = vperm.slane %v1493_v35, 0  ;;  %v673_v49 = vperm.slane %v1374_v62, 7  ;;  %v519_v53 = vperm.slane %v1372_v61, 5 }
  0x9f   :  { %v763_v43 = vadd.f32 %v762_v36, %v750_v18  ;;  %v185_v55 = vsel %vm153_vm1, %v170_v8, %v169_v13  ;;  %v1567_v36 = vld [vmem:[%s2222_s1 + $0x8] ss:$0 sm:$0xff]  ;;  %v465_v56 = vsel %vm163_vm6, %v450_v6, %v464_v51  ;;  %v486_v57 = vsel %vm155_vm2, %v471_v23, %v1490_v33 }
  0xa0   :  { %v1530_v9 = vpop.xlane.xlu1 %93  ;;  %2230 = vst [vmem:[#allocation4_spill] sm:$0xff] %v1567_v36  ;;  %v1577_v3 = vsel %vm165_vm7, %v451_v28, %v465_v56  ;;  %v487_v5 = vsel %vm157_vm3, %v472_v39, %v486_v57  ;;  %v544_v13 = vperm.slane %v1445_v58, 5  ;;  %v546_v23 = vperm.slane %v1493_v35, 5 }
  0xa1   :  { %v1536_v15 = vpop.xlane.xlu0 %90  ;;  %v249_v19 = vperm.slane %v1530_v9, 1  ;;  %v324_v20 = vperm.slane %v1530_v9, 2  ;;  %v399_v34 = vperm.slane %v1530_v9, 3  ;;  %2231 = vst [vmem:[#allocation5_spill] sm:$0xff] %v1577_v3  ;;  %v764_v8 = vmul.f32 0.5, %v763_v43 }
  0xa2   :  { %v248_v25 = vperm.slane %v1536_v15, 1  ;;  %v323_v27 = vperm.slane %v1536_v15, 2  ;;  %v398_v32 = vperm.slane %v1536_v15, 3  ;;  %v473_v33 = vperm.slane %v1536_v15, 4 }
  0xa3   :  { %v474_v18 = vperm.slane %v1530_v9, 4  ;;  %v173_v28 = vperm.slane %v1536_v15, 0  ;;  %1197 = vtanh.f32 %v764_v8  ;;  %v596_v57 = vperm.slane %v1370_v60, 6 }
  0xa4   :  { %v263_v41 = vsel %vm159_vm4, %v248_v25, %v262_v1  ;;  %v338_v42 = vsel %vm159_vm4, %v323_v27, %v337_v2  ;;  %v413_v48 = vsel %vm159_vm4, %v398_v32, %v412_v11  ;;  %v172_v1 = vperm.slane %v1485_v30, 0 }
  0xa5   :  { %v264_v45 = vsel %vm161_vm5, %v249_v19, %v263_v41  ;;  %v339_v46 = vsel %vm161_vm5, %v324_v20, %v338_v42  ;;  %v414_v37 = vsel %vm161_vm5, %v399_v34, %v413_v48  ;;  %v186_v2 = vsel %vm155_vm2, %v171_v40, %v185_v55 }
  0xa6   :  { %v520_v11 = vperm.slane %v1378_v0, 5  ;;  %v522_v19 = vperm.slane %v1376_v63, 5  ;;  %v547_v20 = vperm.slane %v1485_v30, 5  ;;  %v776_v25 = vmul.f32 0.0, %v1567_v36 }
  0xa7   :  { %v187_v27 = vsel %vm157_vm3, %v172_v1, %v186_v2  ;;  %v488_v40 = vsel %vm159_vm4, %v473_v33, %v487_v5  ;;  %v174_v41 = vperm.slane %v1530_v9, 0  ;;  %v560_v48 = vsel %vm153_vm1, %v545_v12, %v544_v13 }
  0xa8   :  { %v1574_v4 = vpop.xlane.xlu1 %96  ;;  %v489_v42 = vsel %vm161_vm5, %v474_v18, %v488_v40  ;;  %v535_v43 = vsel %vm153_vm1, %v520_v11, %v519_v53  ;;  %v561_v56 = vsel %vm155_vm2, %v546_v23, %v560_v48  ;;  %v188_v1 = vsel %vm159_vm4, %v173_v28, %v187_v27  ;;  %v1639_v23 = vld [vmem:[%s2222_s1 + $0x2] ss:$0 sm:$0xff] }
  0xa9   :  { %v1580_v7 = vpop.xlane.xlu0 %115  ;;  %v250_v10 = vperm.slane %v1574_v4, 1  ;;  %v325_v6 = vperm.slane %v1574_v4, 2  ;;  %v400_v38 = vperm.slane %v1574_v4, 3  ;;  %v475_v39 = vperm.slane %v1574_v4, 4  ;;  %v1198_v18 = vpop.eup %1197 }
  0xaa   :  { %v536_v55 = vsel %vm155_vm2, %v521_v50, %v535_v43  ;;  %v562_v5 = vsel %vm157_vm3, %v547_v20, %v561_v56  ;;  %v594_v8 = vperm.slane %v1372_v61, 6  ;;  %v175_v50 = vperm.slane %v1574_v4, 0 }
  0xab   :  { %v265_v32 = vsel %vm163_vm6, %v250_v10, %v264_v45  ;;  %v340_v34 = vsel %vm163_vm6, %v325_v6, %v339_v46  ;;  %v1607_v45 = vld [vmem:[%s2222_s1 + $0x9] ss:$0 sm:$0xff]  ;;  %v415_v46 = vsel %vm163_vm6, %v400_v38, %v414_v37  ;;  %v490_v51 = vsel %vm163_vm6, %v475_v39, %v489_v42  ;;  %v1623_v37 = vld [vmem:[%s2222_s1 + $0x1] ss:$0 sm:$0xff] }
  0xac   :  { %2232 = vst [vmem:[#allocation6_spill] sm:$0xff] %v1607_v45  ;;  %v537_v2 = vsel %vm157_vm3, %v522_v19, %v536_v55  ;;  %v674_v11 = vperm.slane %v1394_v16, 7  ;;  %v597_v12 = vperm.slane %v1376_v63, 6  ;;  %v523_v61 = vperm.slane %v1374_v62, 5 }
  0xad   :  { %v672_v19 = vperm.slane %v1376_v63, 7  ;;  %v595_v20 = vperm.slane %v1378_v0, 6  ;;  %v189_v27 = vsel %vm161_vm5, %v174_v41, %v188_v1  ;;  %v1643_v28 = vadd.f32 %v1607_v45, %v776_v25  ;;  %v1671_v1 = vld [vmem:[%s2222_s1 + $0x7] ss:$0 sm:$0xff] }
  0xae   :  { %v525_v0 = vperm.slane %v1408_v26, 5  ;;  %v752_v40 = vmul.f32 %v1623_v37, %v1483_v29  ;;  %v190_v42 = vsel %vm163_vm6, %v175_v50, %v189_v27  ;;  %v524_v25 = vperm.slane %v1394_v16, 5 }
  0xaf   :  { %v548_v48 = vperm.slane %v1536_v15, 5  ;;  %v1666_v55 = vmul.f32 %v1639_v23, %v1483_v29  ;;  %v766_v56 = vmul.f32 0.5, %v1198_v18  ;;  %v620_v18 = vperm.slane %v1438_v52, 6 }
  0xb0   :  { %v1615_v53 = vpop.xlane.xlu1 %99 }
  0xb1   :  { %v1626_v10 = vpop.xlane.xlu0 %118  ;;  %v251_v6 = vperm.slane %v1615_v53, 1  ;;  %v326_v33 = vperm.slane %v1615_v53, 2  ;;  %v176_v13 = vperm.slane %v1615_v53, 0  ;;  %v401_v63 = vperm.slane %v1615_v53, 3 }
  0xb2   :  { %v476_v41 = vperm.slane %v1615_v53, 4  ;;  %v1696_v52 = vadd.f32 0.5, %v766_v56 }
  0xb3   :  { %v1646_v38 = vsel %vm165_vm7, %v251_v6, %v265_v32  ;;  %v1649_v39 = vsel %vm165_vm7, %v326_v33, %v340_v34  ;;  %v191_v43 = vsel %vm165_vm7, %v176_v13, %v190_v42  ;;  %v1660_v32 = vsel %vm165_vm7, %v401_v63, %v415_v46 }
  0xb4   :  { %2233 = vst [vmem:[#allocation7_spill] sm:$0xff] %v1649_v39  ;;  %v538_v34 = vsel %vm159_vm4, %v523_v61, %v537_v2  ;;  %v1674_v50 = vsel %vm165_vm7, %v476_v41, %v490_v51  ;;  %v526_v33 = vperm.slane %v1403_v22, 5  ;;  %v563_v13 = vsel %vm159_vm4, %v548_v48, %v562_v5 }
  0xb5   :  { %2234 = vst [vmem:[#allocation8_spill] sm:$0xff] %v1660_v32  ;;  %v539_v46 = vsel %vm161_vm5, %v524_v25, %v538_v34  ;;  %v193_v51 = vsel %vm31_vm8, %v191_v43, 0.0  ;;  %v549_v63 = vperm.slane %v1530_v9, 5  ;;  %v619_v42 = vperm.slane %v1445_v58, 6  ;;  %v1703_v58 = vld [vmem:[%s2222_s1 + $0x4] ss:$0 sm:$0xff] }
  0xb6   :  { %2235 = vst [vmem:[#allocation9_spill] sm:$0xff] %v1674_v50  ;;  %v540_v29 = vsel %vm163_vm6, %v525_v0, %v539_v46  ;;  %v195_v34 = vperm.slane %v1580_v7, 0  ;;  %v769_v48 = vmul.f32 0.0, %v1671_v1  ;;  %v270_v43 = vperm.slane %v1580_v7, 1 }
  0xb7   :  { %v753_v46 = vadd.f32 %v752_v40, %v193_v51  ;;  %v1706_v6 = vsel %vm165_vm7, %v526_v33, %v540_v29  ;;  %v550_v25 = vperm.slane %v1574_v4, 5  ;;  %v345_v5 = vperm.slane %v1580_v7, 2 }
  0xb8   :  { %v1678_v2 = vpop.xlane.xlu1 %124  ;;  %2236 = vst [vmem:[#allocation10_spill] sm:$0xff] %v1706_v6  ;;  %v564_v61 = vsel %vm161_vm5, %v549_v63, %v563_v13  ;;  %v610_v41 = vsel %vm153_vm1, %v595_v20, %v594_v8  ;;  %v598_v51 = vperm.slane %v1374_v62, 6  ;;  %v687_v29 = vsel %vm157_vm3, %v672_v19, %v1401_v21 }
  0xb9   :  { %v1685_v27 = vpop.xlane.xlu0 %121  ;;  %v1714_v40 = vsel %vm163_vm6, %v550_v25, %v564_v61  ;;  %v611_v33 = vsel %vm155_vm2, %v596_v57, %v610_v41  ;;  %v720_v0 = vperm.slane %v1580_v7, 7  ;;  %v1725_v13 = vsel %vm153_vm1, %v620_v18, %v619_v42 }
  0xba   :  { %v612_v56 = vsel %vm157_vm3, %v597_v12, %v611_v33  ;;  %v688_v8 = vsel %vm159_vm4, %v673_v49, %v687_v29  ;;  %v196_v20 = vperm.slane %v1626_v10, 0  ;;  %v755_v60 = vadd.f32 %v1703_v58, %v753_v46 }
  0xbb   :  { %v1735_v57 = vsel %vm159_vm4, %v598_v51, %v612_v56  ;;  %v1740_v21 = vsel %vm161_vm5, %v674_v11, %v688_v8  ;;  %v271_v12 = vperm.slane %v1626_v10, 1  ;;  %v346_v62 = vperm.slane %v1626_v10, 2 }
  0xbc   :  { %v721_v49 = vperm.slane %v1626_v10, 7  ;;  %v198_v19 = vperm.slane %v1678_v2, 0  ;;  %v273_v25 = vperm.slane %v1678_v2, 1  ;;  %v348_v11 = vperm.slane %v1678_v2, 2 }
  0xbd   :  { %v197_v46 = vperm.slane %v1685_v27, 0  ;;  %v272_v56 = vperm.slane %v1685_v27, 1  ;;  %v347_v51 = vperm.slane %v1685_v27, 2  ;;  %v770_v50 = vadd.f32 %v769_v48, %v755_v60 }
  0xc0   :  { %v1731_v61 = vpop.xlane.xlu1 %130 }
  0xc1   :  { %v1746_v18 = vpop.xlane.xlu0 %127  ;;  %v1748_v63 = vpop.xlane.xlu2 %112  ;;  %v200_v6 = vperm.slane %v1731_v61, 0 }
  0xc2   :  { %v194_v42 = vperm.slane %v1748_v63, 0  ;;  %v269_v41 = vperm.slane %v1748_v63, 1  ;;  %v344_v33 = vperm.slane %v1748_v63, 2  ;;  %v719_v8 = vperm.slane %v1748_v63, 7 }
  0xc3   :  { %v199_v3 = vperm.slane %v1746_v18, 0  ;;  %v274_v60 = vperm.slane %v1746_v18, 1 }
  0xc4   :  { %v210_v29 = vsel %vm153_vm1, %v195_v34, %v194_v42  ;;  %v285_v31 = vsel %vm153_vm1, %v270_v43, %v269_v41  ;;  %v360_v39 = vsel %vm153_vm1, %v345_v5, %v344_v33  ;;  %v735_v45 = vsel %vm153_vm1, %v720_v0, %v719_v8 }
  0xc5   :  { %v211_v32 = vsel %vm155_vm2, %v196_v20, %v210_v29  ;;  %v286_v36 = vsel %vm155_vm2, %v271_v12, %v285_v31  ;;  %v361_v34 = vsel %vm155_vm2, %v346_v62, %v360_v39  ;;  %v1770_v42 = vsel %vm155_vm2, %v721_v49, %v735_v45 }
  0xc6   :  { %v212_v17 = vsel %vm157_vm3, %v197_v46, %v211_v32  ;;  %v287_v20 = vsel %vm157_vm3, %v272_v56, %v286_v36  ;;  %v419_v43 = vperm.slane %v1748_v63, 3  ;;  %v362_v0 = vsel %vm157_vm3, %v347_v51, %v361_v34 }
  0xc7   :  { %v213_v48 = vsel %vm159_vm4, %v198_v19, %v212_v17  ;;  %v288_v32 = vsel %vm159_vm4, %v273_v25, %v287_v20  ;;  %v349_v17 = vperm.slane %v1746_v18, 2  ;;  %v363_v12 = vsel %vm159_vm4, %v348_v11, %v362_v0 }
  0xc8   :  { %v214_v5 = vsel %vm161_vm5, %v199_v3, %v213_v48  ;;  %v1783_v45 = vsel %vm161_vm5, %v274_v60, %v288_v32  ;;  %v495_v36 = vperm.slane %v1580_v7, 4  ;;  %v771_v3 = vmul.f32 0.5, %v770_v50  ;;  %v1803_v50 = vld [vmem:[%s2222_s1 + $0x5] ss:$0 sm:$0xff] }
  0xc9   :  { %v215_v31 = vsel %vm163_vm6, %v200_v6, %v214_v5  ;;  %v1780_v39 = vpop.xlane.xlu0 %133  ;;  %v779_v49 = vmul.f32 %v1643_v28, %v1696_v52  ;;  %v421_v19 = vperm.slane %v1626_v10, 3  ;;  %v494_v6 = vperm.slane %v1748_v63, 4 }
  0xca   :  { %v201_v62 = vperm.slane %v1780_v39, 0  ;;  %v1794_v41 = vsel %vm161_vm5, %v349_v17, %v363_v12  ;;  %v600_v25 = vperm.slane %v1408_v26, 6  ;;  %v496_v46 = vperm.slane %v1626_v10, 4 }
  0xcb   :  { %v422_v11 = vperm.slane %v1685_v27, 3  ;;  %v2237_v28 = vperm.slane %v1580_v7, 3  ;;  %v497_v51 = vperm.slane %v1685_v27, 4  ;;  %v423_v29 = vperm.slane %v1678_v2, 3 }
  0xcc   :  { %v216_v56 = vsel %vm165_vm7, %v201_v62, %v215_v31  ;;  %1199 = vtanh.f32 %v771_v3  ;;  %v424_v48 = vperm.slane %v1746_v18, 3  ;;  %v569_v20 = vperm.slane %v1748_v63, 5 }
  0xcd   :  { %v435_v52 = vsel %vm153_vm1, %v2237_v28, %v419_v43  ;;  %v218_v33 = vsel %vm31_vm8, %v216_v56, 0.0  ;;  %v498_v5 = vperm.slane %v1678_v2, 4  ;;  %v510_v32 = vsel %vm153_vm1, %v495_v36, %v494_v6 }
  0xce   :  { %v436_v8 = vsel %vm155_vm2, %v421_v19, %v435_v52  ;;  %v758_v34 = vadd.f32 %v1666_v55, %v218_v33  ;;  %v511_v55 = vsel %vm155_vm2, %v496_v46, %v510_v32  ;;  %v551_v17 = vperm.slane %v1615_v53, 5 }
  0xcf   :  { %v437_v60 = vsel %vm157_vm3, %v422_v11, %v436_v8  ;;  %v499_v12 = vperm.slane %v1746_v18, 4  ;;  %v512_v62 = vsel %vm157_vm3, %v497_v51, %v511_v55  ;;  %v599_v3 = vperm.slane %v1394_v16, 6 }
  0xd0   :  { %v438_v43 = vsel %vm159_vm4, %v423_v29, %v437_v60  ;;  %v760_v0 = vadd.f32 %v1803_v50, %v758_v34  ;;  %v601_v19 = vperm.slane %v1403_v22, 6  ;;  %v570_v11 = vperm.slane %v1580_v7, 5 }
  0xd1   :  { %v1822_v31 = vsel %vm161_vm5, %v424_v48, %v438_v43  ;;  %v513_v6 = vsel %vm159_vm4, %v498_v5, %v512_v62  ;;  %v1834_v56 = vsel %vm165_vm7, %v551_v17, %v1714_v40  ;;  %v698_v46 = vperm.slane %v1536_v15, 7 }
  0xd2   :  { %v780_v36 = vadd.f32 %v779_v49, %v760_v0  ;;  %v571_v28 = vperm.slane %v1626_v10, 5  ;;  %v1839_v52 = vsel %vm161_vm5, %v499_v12, %v513_v6  ;;  %v614_v16 = vsel %vm161_vm5, %v599_v3, %v1735_v57  ;;  %v1200_v51 = vpop.eup %1199 }
  0xd3   :  { %v572_v33 = vperm.slane %v1685_v27, 5  ;;  %v585_v49 = vsel %vm153_vm1, %v570_v11, %v569_v20  ;;  %v615_v29 = vsel %vm163_vm6, %v600_v25, %v614_v16  ;;  %v573_v40 = vperm.slane %v1678_v2, 5 }
  0xd4   :  { %1201 = vtanh.f32 %v780_v36  ;;  %v586_v8 = vsel %vm155_vm2, %v571_v28, %v585_v49  ;;  %v1849_v34 = vsel %vm165_vm7, %v601_v19, %v615_v29  ;;  %v623_v48 = vperm.slane %v1536_v15, 6 }
  0xd5   :  { %v700_v60 = vperm.slane %v1574_v4, 7  ;;  %v574_v57 = vperm.slane %v1746_v18, 5  ;;  %v587_v43 = vsel %vm157_vm3, %v572_v33, %v586_v8  ;;  %v624_v5 = vperm.slane %v1530_v9, 6 }
  0xd6   :  { %v773_v20 = vmul.f32 0.5, %v1200_v51  ;;  %v588_v25 = vsel %vm159_vm4, %v573_v40, %v587_v43  ;;  %v625_v32 = vperm.slane %v1574_v4, 6  ;;  %v2238_v0 = vperm.slane %v1493_v35, 6 }
  0xd7   :  { %v1863_v15 = vsel %vm161_vm5, %v574_v57, %v588_v25  ;;  %v2239_v17 = vperm.slane %v1485_v30, 6  ;;  %v2240_v62 = vperm.slane %v1408_v26, 7  ;;  %v2241_v4 = vperm.slane %v1485_v30, 7 }
  0xd8   :  { %v636_v55 = vsel %vm155_vm2, %v2238_v0, %v1725_v13  ;;  %v2242_v13 = vperm.slane %v1403_v22, 7  ;;  %v774_v26 = vadd.f32 0.5, %v773_v20  ;;  %v2243_v30 = vperm.slane %v1530_v9, 7 }
  0xd9   :  { %v637_v12 = vsel %vm157_vm3, %v2239_v17, %v636_v55  ;;  %v690_v3 = vsel %vm163_vm6, %v2240_v62, %v1740_v21  ;;  %v712_v19 = vsel %vm157_vm3, %v2241_v4, %v1520_v59  ;;  %v701_v51 = vperm.slane %v1615_v53, 7 }
  0xda   :  { %v638_v35 = vsel %vm159_vm4, %v623_v48, %v637_v12  ;;  %v1880_v11 = vsel %vm165_vm7, %v2242_v13, %v690_v3  ;;  %v1202_v36 = vpop.eup %1201  ;;  %v713_v28 = vsel %vm159_vm4, %v698_v46, %v712_v19  ;;  %v626_v49 = vperm.slane %v1615_v53, 6 }
  0xdb   :  { %v639_v6 = vsel %vm161_vm5, %v624_v5, %v638_v35  ;;  %v782_v16 = vsub.f32 0.0, %v1202_v36  ;;  %v714_v59 = vsel %vm161_vm5, %v2243_v30, %v713_v28  ;;  %v644_v9 = vperm.slane %v1748_v63, 6 }
  0xdc   :  { %v640_v21 = vsel %vm163_vm6, %v625_v32, %v639_v6  ;;  %v715_v22 = vsel %vm163_vm6, %v700_v60, %v714_v59  ;;  %v645_v48 = vperm.slane %v1580_v7, 6  ;;  %v646_v60 = vperm.slane %v1626_v10, 6 }
  0xdd   :  { %v783_v33 = vmul.f32 %v782_v16, %v774_v26  ;;  %v1893_v46 = vsel %vm165_vm7, %v626_v49, %v640_v21  ;;  %v1896_v40 = vsel %vm165_vm7, %v701_v51, %v715_v22  ;;  %v647_v53 = vperm.slane %v1685_v27, 6  ;;  %v2244_v51 = vld [vmem:[#allocation4_spill] sm:$0xff] }
  0xde   :  { %v660_v57 = vsel %vm153_vm1, %v645_v48, %v644_v9  ;;  %v722_v43 = vperm.slane %v1685_v27, 7  ;;  %v648_v5 = vperm.slane %v1678_v2, 6  ;;  %v723_v25 = vperm.slane %v1678_v2, 7 }
  0xdf   :  { %v784_v29 = vadd.f32 %v1202_v36, %v783_v33  ;;  %v661_v20 = vsel %vm155_vm2, %v646_v60, %v660_v57  ;;  %v649_v32 = vperm.slane %v1746_v18, 6  ;;  %v724_v7 = vperm.slane %v1746_v18, 7  ;;  %v2245_v60 = vld [vmem:[#allocation6_spill] sm:$0xff] }
  0xe0   :  { %v662_v63 = vsel %vm157_vm3, %v647_v53, %v661_v20  ;;  %v737_v0 = vsel %vm157_vm3, %v722_v43, %v1770_v42  ;;  %v243_v18 = vsel %vm31_vm8, %v1428_v44, 0.0  ;;  %v268_v42 = vsel %vm31_vm8, %v1646_v38, 0.0 }
  0xe1   :  { %v788_v8 = vsel %vm785_vm9, %v784_v29, 0.0  ;;  %v663_v10 = vsel %vm159_vm4, %v648_v5, %v662_v63  ;;  %v738_v27 = vsel %vm159_vm4, %v723_v25, %v737_v0  ;;  %v275_v13 = vperm.slane %v1731_v61, 1 }
  0xe2   :  { %789 = vrot.lane.b32.xlu1 %v788_v8, %s1286_s30  ;;  %v1915_v55 = vsel %vm161_vm5, %v649_v32, %v663_v10  ;;  %v1919_v17 = vsel %vm161_vm5, %v724_v7, %v738_v27  ;;  %v800_v35 = vmul.f32 %v1464_v14, %v788_v8  ;;  %v276_v26 = vperm.slane %v1780_v39, 1 }
  0xe3   :  { %v806_v44 = vmul.f32 %v1671_v1, %v788_v8  ;;  %v290_v16 = vsel %vm163_vm6, %v275_v13, %v1783_v45  ;;  %v812_v22 = vmul.f32 %v2244_v51, %v788_v8  ;;  %v350_v13 = vperm.slane %v1731_v61, 2 }
  0xe4   :  { %v291_v21 = vsel %vm165_vm7, %v276_v26, %v290_v16  ;;  %v351_v26 = vperm.slane %v1780_v39, 2 }
  0xe5   :  { %v293_v49 = vsel %vm31_vm8, %v291_v21, 0.0  ;;  %v813_v53 = vadd.f32 %v2245_v60, %v812_v22  ;;  %v365_v16 = vsel %vm163_vm6, %v350_v13, %v1794_v41 }
  0xe6   :  { %v366_v21 = vsel %vm165_vm7, %v351_v26, %v365_v16 }
 0x154   :  { %v790_v2 = vpop.permute.xlu1 %789 }
 0x155   :  { %v791_v12 = vmul.f32 %v1477_v24, %v790_v2  ;;  %v794_v62 = vmul.f32 %v1623_v37, %v790_v2  ;;  %v797_v30 = vmul.f32 %v1639_v23, %v790_v2 }
 0x157   :  { %v792_v3 = vadd.f32 %v791_v12, %v243_v18  ;;  %v795_v4 = vadd.f32 %v794_v62, %v268_v42  ;;  %v798_v29 = vadd.f32 %v797_v30, %v293_v49  ;;  %v2246_v62 = vld [vmem:[#allocation2_spill] sm:$0xff]  ;;  %v2247_v42 = vld [vmem:[#allocation7_spill] sm:$0xff]  ;;  %v368_v49 = vsel %vm31_vm8, %v366_v21, 0.0 }
 0x158   :  { %v318_v18 = vsel %vm31_vm8, %v2246_v62, 0.0  ;;  %v2248_v62 = vld [vmem:[#allocation3_spill] sm:$0xff] }
 0x159   :  { %v793_v19 = vadd.f32 %v1514_v54, %v792_v3  ;;  %v796_v6 = vadd.f32 %v1703_v58, %v795_v4  ;;  %v799_v45 = vadd.f32 %v1803_v50, %v798_v29  ;;  %v343_v3 = vsel %vm31_vm8, %v2247_v42, 0.0  ;;  %v2249_v42 = vld [vmem:[#allocation8_spill] sm:$0xff] }
 0x15b   :  { %v801_v36 = vadd.f32 %v800_v35, %v793_v19  ;;  %v807_v38 = vadd.f32 %v806_v44, %v796_v6 }
 0x15d   :  { %v802_v28 = vmul.f32 0.5, %v801_v36  ;;  %v808_v59 = vmul.f32 0.5, %v807_v38 }
 0x15f   :  { %1203 = vtanh.f32 %v802_v28 }
 0x160   :  { %1205 = vtanh.f32 %v808_v59 }
 0x165   :  { %v1204_v33 = vpop.eup %1203 }
 0x166   :  { %v804_v9 = vmul.f32 0.5, %v1204_v33  ;;  %v1206_v5 = vpop.eup %1205 }
 0x167   :  { %v810_v20 = vmul.f32 0.5, %v1206_v5 }
 0x168   :  { %v805_v48 = vadd.f32 0.5, %v804_v9 }
 0x169   :  { %v811_v32 = vadd.f32 0.5, %v810_v20 }
 0x16a   :  { %v814_v57 = vmul.f32 %v813_v53, %v805_v48 }
 0x16c   :  { %v815_v43 = vadd.f32 %v814_v57, %v799_v45 }
 0x16e   :  { %1207 = vtanh.f32 %v815_v43 }
 0x174   :  { %v1208_v25 = vpop.eup %1207 }
 0x175   :  { %v817_v63 = vsub.f32 %v788_v8, %v1208_v25 }
 0x177   :  { %v818_v7 = vmul.f32 %v817_v63, %v811_v32 }
 0x179   :  { %v819_v10 = vadd.f32 %v1208_v25, %v818_v7 }
 0x17b   :  { %v823_v0 = vsel %vm820_vm10, %v819_v10, %v788_v8 }
 0x17c   :  { %824 = vrot.lane.b32.xlu2 %v823_v0, %s1286_s30  ;;  %v835_v8 = vmul.f32 %v1464_v14, %v823_v0  ;;  %v841_v44 = vmul.f32 %v1671_v1, %v823_v0  ;;  %v847_v22 = vmul.f32 %v2244_v51, %v823_v0 }
 0x17e   :  { %v848_v53 = vadd.f32 %v2245_v60, %v847_v22 }
 0x1d6   :  { %v825_v27 = vpop.permute.xlu2 %824 }
 0x1d7   :  { %v826_v2 = vmul.f32 %v1477_v24, %v825_v27  ;;  %v829_v12 = vmul.f32 %v1623_v37, %v825_v27  ;;  %v832_v30 = vmul.f32 %v1639_v23, %v825_v27 }
 0x1d9   :  { %v827_v4 = vadd.f32 %v826_v2, %v318_v18  ;;  %v830_v19 = vadd.f32 %v829_v12, %v343_v3  ;;  %v833_v29 = vadd.f32 %v832_v30, %v368_v49  ;;  %v393_v18 = vsel %vm31_vm8, %v2248_v62, 0.0 }
 0x1da   :  { %v418_v3 = vsel %vm31_vm8, %v2249_v42, 0.0 }
 0x1db   :  { %v828_v35 = vadd.f32 %v1514_v54, %v827_v4  ;;  %v831_v6 = vadd.f32 %v1703_v58, %v830_v19  ;;  %v834_v41 = vadd.f32 %v1803_v50, %v833_v29 }
 0x1dd   :  { %v836_v36 = vadd.f32 %v835_v8, %v828_v35  ;;  %v842_v38 = vadd.f32 %v841_v44, %v831_v6  ;;  %v425_v8 = vperm.slane %v1731_v61, 3 }
 0x1df   :  { %v837_v28 = vmul.f32 0.5, %v836_v36  ;;  %v843_v59 = vmul.f32 0.5, %v842_v38  ;;  %v440_v44 = vsel %vm163_vm6, %v425_v8, %v1822_v31 }
 0x1e1   :  { %1209 = vtanh.f32 %v837_v28  ;;  %v426_v28 = vperm.slane %v1780_v39, 3 }
 0x1e2   :  { %1211 = vtanh.f32 %v843_v59 }
 0x1e3   :  { %v441_v38 = vsel %vm165_vm7, %v426_v28, %v440_v44 }
 0x1e7   :  { %v1210_v33 = vpop.eup %1209 }
 0x1e8   :  { %v839_v9 = vmul.f32 0.5, %v1210_v33  ;;  %v1212_v43 = vpop.eup %1211  ;;  %v443_v33 = vsel %vm31_vm8, %v441_v38, 0.0 }
 0x1e9   :  { %v845_v5 = vmul.f32 0.5, %v1212_v43 }
 0x1ea   :  { %v840_v48 = vadd.f32 0.5, %v839_v9 }
 0x1eb   :  { %v846_v25 = vadd.f32 0.5, %v845_v5 }
 0x1ec   :  { %v849_v45 = vmul.f32 %v848_v53, %v840_v48 }
 0x1ee   :  { %v850_v57 = vadd.f32 %v849_v45, %v834_v41 }
 0x1f0   :  { %1213 = vtanh.f32 %v850_v57 }
 0x1f6   :  { %v1214_v20 = vpop.eup %1213 }
 0x1f7   :  { %v852_v32 = vsub.f32 %v823_v0, %v1214_v20 }
 0x1f9   :  { %v853_v63 = vmul.f32 %v852_v32, %v846_v25 }
 0x1fb   :  { %v854_v7 = vadd.f32 %v1214_v20, %v853_v63 }
 0x1fd   :  { %v858_v10 = vsel %vm855_vm11, %v854_v7, %v823_v0 }
 0x1fe   :  { %859 = vrot.lane.b32.xlu0 %v858_v10, %s1286_s30  ;;  %v870_v0 = vmul.f32 %v1464_v14, %v858_v10  ;;  %v876_v26 = vmul.f32 %v1671_v1, %v858_v10  ;;  %v882_v59 = vmul.f32 %v2244_v51, %v858_v10 }
 0x200   :  { %v883_v48 = vadd.f32 %v2245_v60, %v882_v59 }
 0x270   :  { %v860_v27 = vpop.permute.xlu0 %859 }
 0x271   :  { %v861_v2 = vmul.f32 %v1477_v24, %v860_v27  ;;  %v864_v12 = vmul.f32 %v1623_v37, %v860_v27  ;;  %v867_v21 = vmul.f32 %v1639_v23, %v860_v27 }
 0x273   :  { %v862_v4 = vadd.f32 %v861_v2, %v393_v18  ;;  %v865_v19 = vadd.f32 %v864_v12, %v418_v3  ;;  %v868_v49 = vadd.f32 %v867_v21, %v443_v33  ;;  %v2250_v12 = vld [vmem:[#allocation5_spill] sm:$0xff] }
 0x274   :  { %v468_v62 = vsel %vm31_vm8, %v2250_v12, 0.0  ;;  %v2251_v18 = vld [vmem:[#allocation9_spill] sm:$0xff]  ;;  %v568_v12 = vsel %vm31_vm8, %v1834_v56, 0.0 }
 0x275   :  { %v863_v35 = vadd.f32 %v1514_v54, %v862_v4  ;;  %v866_v36 = vadd.f32 %v1703_v58, %v865_v19  ;;  %v869_v31 = vadd.f32 %v1803_v50, %v868_v49  ;;  %v493_v42 = vsel %vm31_vm8, %v2251_v18, 0.0 }
 0x277   :  { %v871_v13 = vadd.f32 %v870_v0, %v863_v35  ;;  %v877_v16 = vadd.f32 %v876_v26, %v866_v36  ;;  %v500_v35 = vperm.slane %v1731_v61, 4  ;;  %v501_v36 = vperm.slane %v1780_v39, 4 }
 0x279   :  { %v872_v6 = vmul.f32 0.5, %v871_v13  ;;  %v878_v30 = vmul.f32 0.5, %v877_v16  ;;  %v515_v28 = vsel %vm163_vm6, %v500_v35, %v1839_v52 }
 0x27a   :  { %v516_v44 = vsel %vm165_vm7, %v501_v36, %v515_v28 }
 0x27b   :  { %1215 = vtanh.f32 %v872_v6  ;;  %v518_v59 = vsel %vm31_vm8, %v516_v44, 0.0 }
 0x27c   :  { %1217 = vtanh.f32 %v878_v30 }
 0x281   :  { %v1216_v22 = vpop.eup %1215 }
 0x282   :  { %v874_v29 = vmul.f32 0.5, %v1216_v22  ;;  %v1218_v45 = vpop.eup %1217 }
 0x283   :  { %v880_v57 = vmul.f32 0.5, %v1218_v45 }
 0x284   :  { %v875_v9 = vadd.f32 0.5, %v874_v29 }
 0x285   :  { %v881_v5 = vadd.f32 0.5, %v880_v57 }
 0x286   :  { %v884_v53 = vmul.f32 %v883_v48, %v875_v9 }
 0x288   :  { %v885_v41 = vadd.f32 %v884_v53, %v869_v31 }
 0x28a   :  { %1219 = vtanh.f32 %v885_v41 }
 0x290   :  { %v1220_v43 = vpop.eup %1219 }
 0x291   :  { %v887_v20 = vsub.f32 %v858_v10, %v1220_v43 }
 0x293   :  { %v888_v25 = vmul.f32 %v887_v20, %v881_v5 }
 0x295   :  { %v889_v32 = vadd.f32 %v1220_v43, %v888_v25 }
 0x297   :  { %v893_v63 = vsel %vm890_vm12, %v889_v32, %v858_v10 }
 0x298   :  { %894 = vrot.lane.b32.xlu1 %v893_v63, %s1286_s30  ;;  %v905_v10 = vmul.f32 %v1464_v14, %v893_v63  ;;  %v911_v6 = vmul.f32 %v1671_v1, %v893_v63  ;;  %v917_v21 = vmul.f32 %v2244_v51, %v893_v63 }
 0x29a   :  { %v918_v29 = vadd.f32 %v2245_v60, %v917_v21 }
 0x30a   :  { %v895_v7 = vpop.permute.xlu1 %894 }
 0x30b   :  { %v896_v27 = vmul.f32 %v1477_v24, %v895_v7  ;;  %v899_v2 = vmul.f32 %v1623_v37, %v895_v7  ;;  %v902_v16 = vmul.f32 %v1639_v23, %v895_v7 }
 0x30d   :  { %v897_v3 = vadd.f32 %v896_v27, %v468_v62  ;;  %v900_v4 = vadd.f32 %v899_v2, %v493_v42  ;;  %v903_v22 = vadd.f32 %v902_v16, %v518_v59  ;;  %v2252_v27 = vld [vmem:[#allocation10_spill] sm:$0xff] }
 0x30e   :  { %v543_v2 = vsel %vm31_vm8, %v2252_v27, 0.0 }
 0x30f   :  { %v898_v19 = vadd.f32 %v1514_v54, %v897_v3  ;;  %v901_v8 = vadd.f32 %v1703_v58, %v900_v4  ;;  %v904_v52 = vadd.f32 %v1803_v50, %v903_v22  ;;  %v575_v3 = vperm.slane %v1731_v61, 5 }
 0x311   :  { %v906_v0 = vadd.f32 %v905_v10, %v898_v19  ;;  %v912_v26 = vadd.f32 %v911_v6, %v901_v8  ;;  %v576_v10 = vperm.slane %v1780_v39, 5 }
 0x313   :  { %v907_v13 = vmul.f32 0.5, %v906_v0  ;;  %v913_v38 = vmul.f32 0.5, %v912_v26  ;;  %v590_v0 = vsel %vm163_vm6, %v575_v3, %v1863_v15 }
 0x314   :  { %v591_v8 = vsel %vm165_vm7, %v576_v10, %v590_v0 }
 0x315   :  { %1221 = vtanh.f32 %v907_v13  ;;  %v593_v6 = vsel %vm31_vm8, %v591_v8, 0.0 }
 0x316   :  { %1223 = vtanh.f32 %v913_v38 }
 0x31b   :  { %v1222_v30 = vpop.eup %1221 }
 0x31c   :  { %v909_v33 = vmul.f32 0.5, %v1222_v30  ;;  %v1224_v31 = vpop.eup %1223 }
 0x31d   :  { %v915_v53 = vmul.f32 0.5, %v1224_v31 }
 0x31e   :  { %v910_v49 = vadd.f32 0.5, %v909_v33 }
 0x31f   :  { %v916_v45 = vadd.f32 0.5, %v915_v53 }
 0x320   :  { %v919_v9 = vmul.f32 %v918_v29, %v910_v49 }
 0x322   :  { %v920_v48 = vadd.f32 %v919_v9, %v904_v52 }
 0x324   :  { %1225 = vtanh.f32 %v920_v48  ;;  %v2048_v48 = vld [vmem:[%s2222_s1] ss:$0 sm:$0xff] }
 0x32a   :  { %v1226_v41 = vpop.eup %1225 }
 0x32b   :  { %v922_v57 = vsub.f32 %v893_v63, %v1226_v41 }
 0x32d   :  { %v923_v43 = vmul.f32 %v922_v57, %v916_v45  ;;  %v643_v45 = vsel %vm31_vm8, %v1893_v46, 0.0 }
 0x32f   :  { %v924_v5 = vadd.f32 %v1226_v41, %v923_v43  ;;  %v618_v41 = vsel %vm31_vm8, %v1849_v34, 0.0 }
 0x331   :  { %v928_v20 = vsel %vm925_vm13, %v924_v5, %v893_v63  ;;  %v2061_v5 = vld [vmem:[%s2222_s1 + $0x3] ss:$0 sm:$0xff] }
 0x332   :  { %929 = vrot.lane.b32.xlu2 %v928_v20, %s1286_s30  ;;  %v940_v63 = vmul.f32 %v1464_v14, %v928_v20  ;;  %v946_v35 = vmul.f32 %v1671_v1, %v928_v20  ;;  %v952_v14 = vmul.f32 %v2244_v51, %v928_v20 }
 0x334   :  { %v953_v16 = vadd.f32 %v2245_v60, %v952_v14 }
 0x38c   :  { %v930_v25 = vpop.permute.xlu2 %929 }
 0x38d   :  { %v931_v32 = vmul.f32 %v1477_v24, %v930_v25  ;;  %v934_v7 = vmul.f32 %v1623_v37, %v930_v25 }
 0x38f   :  { %v932_v62 = vadd.f32 %v931_v32, %v543_v2  ;;  %v935_v18 = vadd.f32 %v934_v7, %v568_v12  ;;  %v650_v32 = vperm.slane %v1731_v61, 6  ;;  %v651_v2 = vperm.slane %v1780_v39, 6 }
 0x391   :  { %v933_v42 = vadd.f32 %v1514_v54, %v932_v62  ;;  %v936_v24 = vadd.f32 %v1703_v58, %v935_v18  ;;  %v937_v54 = vmul.f32 %v1639_v23, %v930_v25  ;;  %v2067_v25 = vld [vmem:[%s2222_s1 + $0x6] ss:$0 sm:$0xff]  ;;  %v665_v62 = vsel %vm163_vm6, %v650_v32, %v1915_v55 }
 0x393   :  { %v941_v4 = vadd.f32 %v940_v63, %v933_v42  ;;  %v947_v56 = vadd.f32 %v946_v35, %v936_v24  ;;  %v938_v28 = vadd.f32 %v937_v54, %v593_v6  ;;  %v666_v42 = vsel %vm165_vm7, %v651_v2, %v665_v62 }
 0x395   :  { %v942_v19 = vmul.f32 0.5, %v941_v4  ;;  %v948_v13 = vmul.f32 0.5, %v947_v56  ;;  %v939_v15 = vadd.f32 %v1803_v50, %v938_v28 }
 0x397   :  { %1227 = vtanh.f32 %v942_v19  ;;  %v668_v19 = vsel %vm31_vm8, %v666_v42, 0.0 }
 0x398   :  { %1229 = vtanh.f32 %v948_v13 }
 0x39d   :  { %v1228_v36 = vpop.eup %1227 }
 0x39e   :  { %v944_v26 = vmul.f32 0.5, %v1228_v36  ;;  %v1230_v30 = vpop.eup %1229 }
 0x39f   :  { %v950_v59 = vmul.f32 0.5, %v1230_v30 }
 0x3a0   :  { %v945_v44 = vadd.f32 0.5, %v944_v26 }
 0x3a1   :  { %v951_v33 = vadd.f32 0.5, %v950_v59 }
 0x3a2   :  { %v954_v38 = vmul.f32 %v953_v16, %v945_v44 }
 0x3a4   :  { %v955_v21 = vadd.f32 %v954_v38, %v939_v15  ;;  %v2089_v38 = vsel %vm31_vm8, %v1880_v11, 0.0 }
 0x3a6   :  { %1231 = vtanh.f32 %v955_v21  ;;  %v2094_v21 = vsel %vm31_vm8, %v1896_v40, 0.0 }
 0x3ac   :  { %v1232_v22 = vpop.eup %1231 }
 0x3ad   :  { %v957_v49 = vsub.f32 %v928_v20, %v1232_v22 }
 0x3af   :  { %v958_v29 = vmul.f32 %v957_v49, %v951_v33  ;;  %v725_v49 = vperm.slane %v1731_v61, 7  ;;  %v2111_v61 = vld [vmem:[%s2222_s1 + $0x8] ss:$0 sm:$0xff] }
 0x3b1   :  { %v959_v52 = vadd.f32 %v1232_v22, %v958_v29  ;;  %v740_v40 = vsel %vm163_vm6, %v725_v49, %v1919_v17 }
 0x3b3   :  { %960 = vrot.lane.b32.xlu0 %v959_v52, %s1286_s30  ;;  %v971_v34 = vmul.f32 %v2067_v25, %v959_v52  ;;  %v977_v12 = vmul.f32 %v1671_v1, %v959_v52  ;;  %v983_v4 = vmul.f32 %v2244_v51, %v959_v52 }
 0x3b5   :  { %v984_v56 = vadd.f32 %v2245_v60, %v983_v4 }
 0x425   :  { %v961_v9 = vpop.permute.xlu0 %960 }
 0x426   :  { %v962_v31 = vmul.f32 %v2048_v48, %v961_v9  ;;  %v965_v53 = vmul.f32 %v1623_v37, %v961_v9  ;;  %v968_v63 = vmul.f32 %v1639_v23, %v961_v9  ;;  %v726_v9 = vperm.slane %v1780_v39, 7 }
 0x428   :  { %v963_v57 = vadd.f32 %v962_v31, %v618_v41  ;;  %v966_v43 = vadd.f32 %v965_v53, %v643_v45  ;;  %v969_v10 = vadd.f32 %v968_v63, %v668_v19  ;;  %v741_v41 = vsel %vm165_vm7, %v726_v9, %v740_v40 }
 0x42a   :  { %v964_v20 = vadd.f32 %v2061_v5, %v963_v57  ;;  %v967_v46 = vadd.f32 %v1703_v58, %v966_v43  ;;  %v970_v55 = vadd.f32 %v1803_v50, %v969_v10 }
 0x42c   :  { %v972_v7 = vadd.f32 %v971_v34, %v964_v20  ;;  %v978_v18 = vadd.f32 %v977_v12, %v967_v46  ;;  %v2116_v20 = vsel %vm31_vm8, %v741_v41, 0.0 }
 0x42e   :  { %v973_v27 = vmul.f32 0.5, %v972_v7  ;;  %v979_v3 = vmul.f32 0.5, %v978_v18 }
 0x430   :  { %1233 = vtanh.f32 %v973_v27 }
 0x431   :  { %1235 = vtanh.f32 %v979_v3 }
 0x436   :  { %v1234_v24 = vpop.eup %1233 }
 0x437   :  { %v975_v35 = vmul.f32 0.5, %v1234_v24  ;;  %v1236_v14 = vpop.eup %1235 }
 0x438   :  { %v981_v13 = vmul.f32 0.5, %v1236_v14 }
 0x439   :  { %v976_v0 = vadd.f32 0.5, %v975_v35 }
 0x43a   :  { %v982_v6 = vadd.f32 0.5, %v981_v13 }
 0x43b   :  { %v985_v8 = vmul.f32 %v984_v56, %v976_v0 }
 0x43d   :  { %v986_v54 = vadd.f32 %v985_v8, %v970_v55 }
 0x43f   :  { %1237 = vtanh.f32 %v986_v54 }
 0x445   :  { %v1238_v36 = vpop.eup %1237 }
 0x446   :  { %v988_v51 = vsub.f32 %v959_v52, %v1238_v36 }
 0x448   :  { %v989_v28 = vmul.f32 %v988_v51, %v982_v6 }
 0x44a   :  { %v990_v26 = vadd.f32 %v1238_v36, %v989_v28 }
 0x44c   :  { %991 = vrot.lane.b32.xlu1 %v990_v26, %s1286_s30  ;;  %v1002_v33 = vmul.f32 %v2067_v25, %v990_v26  ;;  %v1008_v31 = vmul.f32 %v1671_v1, %v990_v26  ;;  %v1014_v43 = vmul.f32 %v2111_v61, %v990_v26 }
 0x44e   :  { %v1015_v7 = vadd.f32 %v2245_v60, %v1014_v43 }
 0x4be   :  { %v992_v44 = vpop.permute.xlu1 %991 }
 0x4bf   :  { %v993_v16 = vmul.f32 %v2048_v48, %v992_v44  ;;  %v996_v15 = vmul.f32 %v1623_v37, %v992_v44  ;;  %v999_v45 = vmul.f32 %v1639_v23, %v992_v44  ;;  %v2136_v44 = vld [vmem:[%s2222_s1 + $0x9] ss:$0 sm:$0xff] }
 0x4c1   :  { %v994_v30 = vadd.f32 %v993_v16, %v2089_v38  ;;  %v997_v59 = vadd.f32 %v996_v15, %v2094_v21  ;;  %v1000_v17 = vadd.f32 %v999_v45, %v2116_v20 }
 0x4c3   :  { %v995_v22 = vadd.f32 %v2061_v5, %v994_v30  ;;  %v998_v52 = vadd.f32 %v1703_v58, %v997_v59  ;;  %v1001_v46 = vadd.f32 %v1803_v50, %v1000_v17 }
 0x4c5   :  { %v1003_v29 = vadd.f32 %v1002_v33, %v995_v22  ;;  %v1009_v53 = vadd.f32 %v1008_v31, %v998_v52  ;;  %v2145_v31 = vld [vmem:[%s2222_s1 + $0x1] ss:$0 sm:$0xff] }
 0x4c7   :  { %v1004_v11 = vmul.f32 0.5, %v1003_v29  ;;  %v1010_v57 = vmul.f32 0.5, %v1009_v53 }
 0x4c9   :  { %1239 = vtanh.f32 %v1004_v11 }
 0x4ca   :  { %1241 = vtanh.f32 %v1010_v57 }
 0x4cf   :  { %v1240_v39 = vpop.eup %1239 }
 0x4d0   :  { %v1006_v34 = vmul.f32 0.5, %v1240_v39  ;;  %v1242_v12 = vpop.eup %1241 }
 0x4d1   :  { %v1012_v62 = vmul.f32 0.5, %v1242_v12 }
 0x4d2   :  { %v1007_v32 = vadd.f32 0.5, %v1006_v34  ;;  %v2156_v34 = vld [vmem:[%s2222_s1 + $0x7] ss:$0 sm:$0xff] }
 0x4d3   :  { %v1013_v42 = vadd.f32 0.5, %v1012_v62 }
 0x4d4   :  { %v1016_v27 = vmul.f32 %v1015_v7, %v1007_v32 }
 0x4d6   :  { %v1017_v2 = vadd.f32 %v1016_v27, %v1001_v46  ;;  %v2162_v46 = vld [vmem:[%s2222_s1 + $0x2] ss:$0 sm:$0xff] }
 0x4d8   :  { %1243 = vtanh.f32 %v1017_v2 }
 0x4de   :  { %v1244_v18 = vpop.eup %1243 }
 0x4df   :  { %v1019_v63 = vsub.f32 %v990_v26, %v1244_v18 }
 0x4e1   :  { %v1020_v47 = vmul.f32 %v1019_v63, %v1013_v42 }
 0x4e3   :  { %v1021_v3 = vadd.f32 %v1244_v18, %v1020_v47 }
 0x4e5   :  { %1022 = vrot.lane.b32.xlu2 %v1021_v3, %s1286_s30  ;;  %v1033_v0 = vmul.f32 %v2067_v25, %v1021_v3  ;;  %v1039_v54 = vmul.f32 %v1671_v1, %v1021_v3 }
 0x53f   :  { %v1023_v4 = vpop.permute.xlu2 %1022 }
 0x540   :  { %v1024_v24 = vmul.f32 %v2048_v48, %v1023_v4  ;;  %v1027_v19 = vmul.f32 %v1623_v37, %v1023_v4  ;;  %v1030_v13 = vmul.f32 %v1639_v23, %v1023_v4  ;;  %v1045_v37 = vmul.f32 %v2111_v61, %v1021_v3 }
 0x542   :  { %v1025_v60 = vadd.f32 %v1024_v24, %v2089_v38  ;;  %v1028_v10 = vadd.f32 %v1027_v19, %v2094_v21  ;;  %v1031_v51 = vadd.f32 %v1030_v13, %v2116_v20  ;;  %v1046_v1 = vadd.f32 %v2136_v44, %v1045_v37 }
 0x544   :  { %v1026_v35 = vadd.f32 %v2061_v5, %v1025_v60  ;;  %v1029_v55 = vadd.f32 %v1703_v58, %v1028_v10  ;;  %v1032_v16 = vadd.f32 %v1803_v50, %v1031_v51  ;;  %v2179_v51 = vld [vmem:[%s2222_s1 + $0x4] ss:$0 sm:$0xff] }
 0x546   :  { %v1034_v56 = vadd.f32 %v1033_v0, %v1026_v35  ;;  %v1040_v14 = vadd.f32 %v1039_v54, %v1029_v55 }
 0x548   :  { %v1035_v8 = vmul.f32 0.5, %v1034_v56  ;;  %v1041_v36 = vmul.f32 0.5, %v1040_v14 }
 0x54a   :  { %1245 = vtanh.f32 %v1035_v8 }
 0x54b   :  { %1247 = vtanh.f32 %v1041_v36 }
 0x550   :  { %v1246_v6 = vpop.eup %1245 }
 0x551   :  { %v1037_v28 = vmul.f32 0.5, %v1246_v6  ;;  %v1248_v30 = vpop.eup %1247 }
 0x552   :  { %v1043_v59 = vmul.f32 0.5, %v1248_v30 }
 0x553   :  { %v1038_v26 = vadd.f32 0.5, %v1037_v28 }
 0x554   :  { %v1044_v33 = vadd.f32 0.5, %v1043_v59 }
 0x555   :  { %v1047_v15 = vmul.f32 %v1046_v1, %v1038_v26 }
 0x557   :  { %v1048_v23 = vadd.f32 %v1047_v15, %v1032_v16 }
 0x559   :  { %1249 = vtanh.f32 %v1048_v23 }
 0x55f   :  { %v1250_v22 = vpop.eup %1249 }
 0x560   :  { %v1050_v49 = vsub.f32 %v1021_v3, %v1250_v22 }
 0x562   :  { %v1051_v29 = vmul.f32 %v1050_v49, %v1044_v33 }
 0x564   :  { %v1052_v52 = vadd.f32 %v1250_v22, %v1051_v29 }
 0x566   :  { %1053 = vrot.lane.b32.xlu0 %v1052_v52, %s1286_s30  ;;  %v1064_v57 = vmul.f32 %v2067_v25, %v1052_v52  ;;  %v1070_v32 = vmul.f32 %v2156_v34, %v1052_v52 }
 0x5d8   :  { %v1054_v11 = vpop.permute.xlu0 %1053 }
 0x5d9   :  { %v1055_v9 = vmul.f32 %v2048_v48, %v1054_v11  ;;  %v1058_v40 = vmul.f32 %v2145_v31, %v1054_v11  ;;  %v1061_v27 = vmul.f32 %v2162_v46, %v1054_v11 }
 0x5db   :  { %v1056_v53 = vadd.f32 %v1055_v9, %v2089_v38  ;;  %v1059_v41 = vadd.f32 %v1058_v40, %v2094_v21  ;;  %v1062_v62 = vadd.f32 %v1061_v27, %v2116_v20 }
 0x5dd   :  { %v1057_v45 = vadd.f32 %v2061_v5, %v1056_v53  ;;  %v1060_v39 = vadd.f32 %v1703_v58, %v1059_v41  ;;  %v1076_v58 = vmul.f32 %v2111_v61, %v1052_v52  ;;  %v1063_v47 = vadd.f32 %v1803_v50, %v1062_v62 }
 0x5df   :  { %v1065_v43 = vadd.f32 %v1064_v57, %v1057_v45  ;;  %v1071_v7 = vadd.f32 %v1070_v32, %v1060_v39  ;;  %v1077_v63 = vadd.f32 %v2136_v44, %v1076_v58 }
 0x5e1   :  { %v1066_v17 = vmul.f32 0.5, %v1065_v43  ;;  %v1072_v2 = vmul.f32 0.5, %v1071_v7 }
 0x5e3   :  { %1251 = vtanh.f32 %v1066_v17 }
 0x5e4   :  { %1253 = vtanh.f32 %v1072_v2 }
 0x5e9   :  { %v1252_v12 = vpop.eup %1251 }
 0x5ea   :  { %v1068_v18 = vmul.f32 0.5, %v1252_v12  ;;  %v1254_v24 = vpop.eup %1253 }
 0x5eb   :  { %v1074_v19 = vmul.f32 0.5, %v1254_v24 }
 0x5ec   :  { %v1069_v42 = vadd.f32 0.5, %v1068_v18 }
 0x5ed   :  { %v1075_v10 = vadd.f32 0.5, %v1074_v19 }
 0x5ee   :  { %v1078_v3 = vmul.f32 %v1077_v63, %v1069_v42 }
 0x5f0   :  { %v1079_v4 = vadd.f32 %v1078_v3, %v1063_v47 }
 0x5f2   :  { %1255 = vtanh.f32 %v1079_v4 }
 0x5f8   :  { %v1256_v60 = vpop.eup %1255 }
 0x5f9   :  { %v1081_v35 = vsub.f32 %v1052_v52, %v1256_v60 }
 0x5fb   :  { %v1082_v0 = vmul.f32 %v1081_v35, %v1075_v10 }
 0x5fd   :  { %v1083_v56 = vadd.f32 %v1256_v60, %v1082_v0 }
 0x5ff   :  { %1084 = vrot.lane.b32.xlu1 %v1083_v56, %s1286_s30  ;;  %v1095_v37 = vmul.f32 %v2067_v25, %v1083_v56  ;;  %v1101_v1 = vmul.f32 %v2156_v34, %v1083_v56  ;;  %v1107_v30 = vmul.f32 %v2111_v61, %v1083_v56 }
 0x601   :  { %v1108_v29 = vadd.f32 %v2136_v44, %v1107_v30 }
 0x671   :  { %v1085_v55 = vpop.permute.xlu1 %1084 }
 0x672   :  { %v1086_v8 = vmul.f32 %v2048_v48, %v1085_v55  ;;  %v1089_v54 = vmul.f32 %v2145_v31, %v1085_v55  ;;  %v1092_v15 = vmul.f32 %v2162_v46, %v1085_v55 }
 0x674   :  { %v1087_v14 = vadd.f32 %v1086_v8, %v2089_v38  ;;  %v1090_v13 = vadd.f32 %v1089_v54, %v2094_v21  ;;  %v1093_v22 = vadd.f32 %v1092_v15, %v2116_v20 }
 0x676   :  { %v1088_v36 = vadd.f32 %v2061_v5, %v1087_v14  ;;  %v1091_v28 = vadd.f32 %v2179_v51, %v1090_v13  ;;  %v1094_v52 = vadd.f32 %v1803_v50, %v1093_v22 }
 0x678   :  { %v1096_v6 = vadd.f32 %v1095_v37, %v1088_v36  ;;  %v1102_v16 = vadd.f32 %v1101_v1, %v1091_v28 }
 0x67a   :  { %v1097_v26 = vmul.f32 0.5, %v1096_v6  ;;  %v1103_v23 = vmul.f32 0.5, %v1102_v16 }
 0x67c   :  { %1257 = vtanh.f32 %v1097_v26 }
 0x67d   :  { %1259 = vtanh.f32 %v1103_v23 }
 0x682   :  { %v1258_v59 = vpop.eup %1257 }
 0x683   :  { %v1099_v33 = vmul.f32 0.5, %v1258_v59  ;;  %v1260_v40 = vpop.eup %1259 }
 0x684   :  { %v1105_v53 = vmul.f32 0.5, %v1260_v40 }
 0x685   :  { %v1100_v49 = vadd.f32 0.5, %v1099_v33 }
 0x686   :  { %v1106_v45 = vadd.f32 0.5, %v1105_v53 }
 0x687   :  { %v1109_v11 = vmul.f32 %v1108_v29, %v1100_v49 }
 0x689   :  { %v1110_v9 = vadd.f32 %v1109_v11, %v1094_v52 }
 0x68b   :  { %1261 = vtanh.f32 %v1110_v9 }
 0x691   :  { %v1262_v41 = vpop.eup %1261 }
 0x692   :  { %v1112_v57 = vsub.f32 %v1083_v56, %v1262_v41 }
 0x694   :  { %v1113_v43 = vmul.f32 %v1112_v57, %v1106_v45 }
 0x696   :  { %v1114_v39 = vadd.f32 %v1262_v41, %v1113_v43 }
 0x698   :  { %1115 = vrot.lane.b32.xlu2 %v1114_v39, %s1286_s30  ;;  %v1126_v12 = vmul.f32 %v2067_v25, %v1114_v39  ;;  %v1132_v63 = vmul.f32 %v2156_v34, %v1114_v39  ;;  %v1138_v24 = vmul.f32 %v2111_v61, %v1114_v39 }
 0x69a   :  { %v1139_v0 = vadd.f32 %v2136_v44, %v1138_v24 }
 0x6f2   :  { %v1116_v17 = vpop.permute.xlu2 %1115 }
 0x6f3   :  { %v1117_v32 = vmul.f32 %v2048_v48, %v1116_v17  ;;  %v1120_v7 = vmul.f32 %v2145_v31, %v1116_v17  ;;  %v1123_v3 = vmul.f32 %v2162_v46, %v1116_v17 }
 0x6f5   :  { %v1118_v27 = vadd.f32 %v1117_v32, %v2089_v38  ;;  %v1121_v2 = vadd.f32 %v1120_v7, %v2094_v21  ;;  %v1124_v60 = vadd.f32 %v1123_v3, %v2116_v20 }
 0x6f7   :  { %v1119_v58 = vadd.f32 %v2061_v5, %v1118_v27  ;;  %v1122_v18 = vadd.f32 %v2179_v51, %v1121_v2  ;;  %v1125_v56 = vadd.f32 %v1803_v50, %v1124_v60 }
 0x6f9   :  { %v1127_v62 = vadd.f32 %v1126_v12, %v1119_v58  ;;  %v1133_v47 = vadd.f32 %v1132_v63, %v1122_v18 }
 0x6fb   :  { %v1128_v42 = vmul.f32 0.5, %v1127_v62  ;;  %v1134_v4 = vmul.f32 0.5, %v1133_v47 }
 0x6fd   :  { %1263 = vtanh.f32 %v1128_v42 }
 0x6fe   :  { %1265 = vtanh.f32 %v1134_v4 }
 0x703   :  { %v1264_v19 = vpop.eup %1263 }
 0x704   :  { %v1130_v10 = vmul.f32 0.5, %v1264_v19  ;;  %v1266_v54 = vpop.eup %1265 }
 0x705   :  { %v1136_v14 = vmul.f32 0.5, %v1266_v54 }
 0x706   :  { %v1131_v35 = vadd.f32 0.5, %v1130_v10 }
 0x707   :  { %v1137_v36 = vadd.f32 0.5, %v1136_v14 }
 0x708   :  { %v1140_v55 = vmul.f32 %v1139_v0, %v1131_v35 }
 0x70a   :  { %v1141_v8 = vadd.f32 %v1140_v55, %v1125_v56 }
 0x70c   :  { %1267 = vtanh.f32 %v1141_v8 }
 0x712   :  { %v1268_v13 = vpop.eup %1267 }
 0x713   :  { %v1143_v37 = vsub.f32 %v1114_v39, %v1268_v13 }
 0x715   :  { %v1144_v6 = vmul.f32 %v1143_v37, %v1137_v36 }
 0x717   :  { %v1145_v28 = vadd.f32 %v1268_v13, %v1144_v6 }
 0x719   :  { %1146 = vrot.lane.b32.xlu0 %v1145_v28, %s1286_s30  ;;  %v1157_v30 = vmul.f32 %v2067_v25, %v1145_v28  ;;  %v1163_v49 = vmul.f32 %v2156_v34, %v1145_v28 }
 0x78b   :  { %v1147_v26 = vpop.permute.xlu0 %1146 }
 0x78c   :  { %v1148_v1 = vmul.f32 %v2048_v48, %v1147_v26  ;;  %v1151_v16 = vmul.f32 %v2145_v31, %v1147_v26  ;;  %v1154_v48 = vmul.f32 %v2162_v46, %v1147_v26  ;;  %v1169_v31 = vmul.f32 %v2111_v61, %v1145_v28 }
 0x78e   :  { %v1149_v15 = vadd.f32 %v1148_v1, %v2089_v38  ;;  %v1152_v50 = vadd.f32 %v1151_v16, %v2094_v21  ;;  %v1155_v21 = vadd.f32 %v1154_v48, %v2116_v20  ;;  %v1170_v25 = vadd.f32 %v2136_v44, %v1169_v31 }
 0x790   :  { %v1150_v23 = vadd.f32 %v2061_v5, %v1149_v15  ;;  %v1153_v22 = vadd.f32 %v2179_v51, %v1152_v50  ;;  %v1284_v51 = vld [vmem:[%s2222_s1 + $0x5] ss:$0 sm:$0xff] }
 0x791   :  { %v1156_v34 = vadd.f32 %v1284_v51, %v1155_v21 }
 0x792   :  { %v1158_v59 = vadd.f32 %v1157_v30, %v1150_v23  ;;  %v1164_v29 = vadd.f32 %v1163_v49, %v1153_v22 }
 0x794   :  { %v1159_v33 = vmul.f32 0.5, %v1158_v59  ;;  %v1165_v52 = vmul.f32 0.5, %v1164_v29 }
 0x796   :  { %1269 = vtanh.f32 %v1159_v33 }
 0x797   :  { %1271 = vtanh.f32 %v1165_v52 }
 0x79c   :  { %v1270_v38 = vpop.eup %1269 }
 0x79d   :  { %v1161_v11 = vmul.f32 0.5, %v1270_v38  ;;  %v1272_v53 = vpop.eup %1271 }
 0x79e   :  { %v1167_v46 = vmul.f32 0.5, %v1272_v53 }
 0x79f   :  { %v1162_v5 = vadd.f32 0.5, %v1161_v11 }
 0x7a0   :  { %v1168_v61 = vadd.f32 0.5, %v1167_v46 }
 0x7a1   :  { %v1171_v9 = vmul.f32 %v1170_v25, %v1162_v5 }
 0x7a3   :  { %v1172_v40 = vadd.f32 %v1171_v9, %v1156_v34 }
 0x7a5   :  { %1273 = vtanh.f32 %v1172_v40 }
 0x7ab   :  { %v1274_v41 = vpop.eup %1273 }
 0x7ac   :  { %v1174_v45 = vsub.f32 %v1145_v28, %v1274_v41 }
 0x7ae   :  { %v1175_v57 = vmul.f32 %v1174_v45, %v1168_v61 }
 0x7b0   :  { %v1176_v20 = vadd.f32 %v1274_v41, %v1175_v57 }
 0x7b2   :  { %1177 = vst [vmem:[%s2223_s2] sm:$0xff] %v1176_v20 }

</bundles_post_ra>
